<compile_context>
chip_gen: v5e
topology: v5e:2x2
jax: 0.10.0
libtpu: 0.0.40
codegen_flags: <defaults>
</compile_context>

<pallas_src>
import functools
import math

import jax
import jax.numpy as jnp
from jax.experimental import pallas as pl
from jax.experimental.pallas import tpu as pltpu

BN_EPS = 1e-5
VMEM_LIMIT = 40 * 1024 * 1024   # safe on v7x (64 MiB/TC) and v5e/v6e (128 MiB)


def _round_up(x, m):
    return -(-x // m) * m


def _conv_out_hw(H, W, kh, kw, stride, pad):
    return (H + 2 * pad - kh) // stride + 1, (W + 2 * pad - kw) // stride + 1


# --------------------------------------------------------------------------
# Matmul kernels with fused per-row-tile BN batch-statistics
#   stats outputs: shape (num_row_tiles, 1, N); block (1, 1, tn) indexed (i, j)
#   -> every (i, j) grid point owns its own stats block, so both i and j can
#      be "parallel" (megacore) and nothing is accumulated across grid steps.
# --------------------------------------------------------------------------

def _mm_stats_1k(a_ref, b_ref, o_ref, s_ref, q_ref):
    # single contraction step: no accumulator scratch round-trip
    c = jnp.dot(a_ref[...], b_ref[...], preferred_element_type=jnp.float32)
    o_ref[...] = c.astype(o_ref.dtype)
    s_ref[...] = jnp.sum(c, axis=0, keepdims=True)[None]
    q_ref[...] = jnp.sum(c * c, axis=0, keepdims=True)[None]


def _mm_stats_mk(a_ref, b_ref, o_ref, s_ref, q_ref, acc_ref):
    k = pl.program_id(2)

    @pl.when(k == 0)
    def _():
        acc_ref[...] = jnp.zeros_like(acc_ref)

    acc_ref[...] += jnp.dot(a_ref[...], b_ref[...],
                            preferred_element_type=jnp.float32)

    @pl.when(k == pl.num_programs(2) - 1)
    def _():
        c = acc_ref[...]
        o_ref[...] = c.astype(o_ref.dtype)
        s_ref[...] = jnp.sum(c, axis=0, keepdims=True)[None]
        q_ref[...] = jnp.sum(c * c, axis=0, keepdims=True)[None]


def _mm_bn_stats_1k(a_ref, sa_ref, ba_ref, b_ref, o_ref, s_ref, q_ref,
                    *, tm, m_true):
    """Single-k matmul whose A tile gets BN scale/bias + ReLU applied on load.

    Used for the 1x1 convs that consume the (pre-BN) output of the previous
    conv; the VPU work hides under the MXU.  Rows beyond the true M are masked
    to zero so the (M-padding) rows do not pollute the output statistics."""
    i = pl.program_id(1)
    a = a_ref[...].astype(jnp.float32) * sa_ref[...] + ba_ref[...]
    a = jnp.maximum(a, 0.0)
    valid = m_true - i * tm
    rows = jax.lax.broadcasted_iota(jnp.int32, (a.shape[0], 1), 0)
    a = jnp.where(rows < valid, a, 0.0).astype(jnp.bfloat16)
    c = jnp.dot(a, b_ref[...], preferred_element_type=jnp.float32)
    o_ref[...] = c.astype(o_ref.dtype)
    s_ref[...] = jnp.sum(c, axis=0, keepdims=True)[None]
    q_ref[...] = jnp.sum(c * c, axis=0, keepdims=True)[None]


def conv_matmul_stats(a, b, scale_bias=None):
    """(M,K) @ (K,N): bf16 operands, f32 accumulation.

    Returns (out_bf16[M,N], part_sum_f32[R,N], part_sumsq_f32[R,N]) where the
    partials are the per-row-tile column sums / sums-of-squares of the conv
    output (zero-padded rows contribute nothing); divide by the true row count
    after reducing over R.  If `scale_bias=(sa, ba)` is given (each (1,K)),
    the A operand is treated as a pre-BN activation and relu(a*sa+ba) is
    applied on load inside the kernel (only used for 1x1 convs, single k)."""
    M, K = a.shape
    _, N = b.shape

    tn = N if N <= 256 else 256
    cap_m = 512 if tn < 128 else 256          # widen rows for narrow outputs
    tm = min(cap_m, _round_up(M, 16))
    Kp = _round_up(K, 128)                    # lane-aligned, zero padded
    tk = Kp if Kp <= 4608 else 512            # single k-step for all ResNet-50 convs
    Kp = _round_up(Kp, tk)
    Mp = _round_up(M, tm)
    Np = _round_up(N, tn)
    ni = Mp // tm
    nk = Kp // tk

    a_p = a.astype(jnp.bfloat16)
    b_p = b.astype(jnp.bfloat16)
    if (Mp, Kp) != (M, K):
        a_p = jnp.pad(a_p, ((0, Mp - M), (0, Kp - K)))
    if (Kp, Np) != (K, N):
        b_p = jnp.pad(b_p, ((0, Kp - K), (0, Np - N)))

    # grid (j, i, k): with nk==1 the B tile (K x tn) stays VMEM-resident across
    # the whole row sweep of a column tile; both j and i are parallel.
    grid = (Np // tn, ni, nk)

    a_spec = pl.BlockSpec((tm, tk), lambda j, i, k: (i, k))
    b_spec = pl.BlockSpec((tk, tn), lambda j, i, k: (k, j))
    out_specs = [pl.BlockSpec((tm, tn), lambda j, i, k: (i, j)),
                 pl.BlockSpec((1, 1, tn), lambda j, i, k: (i, 0, j)),
                 pl.BlockSpec((1, 1, tn), lambda j, i, k: (i, 0, j))]
    out_shape = (jax.ShapeDtypeStruct((Mp, Np), jnp.bfloat16),
                 jax.ShapeDtypeStruct((ni, 1, Np), jnp.float32),
                 jax.ShapeDtypeStruct((ni, 1, Np), jnp.float32))

    if scale_bias is not None:
        assert nk == 1, "fused A-side BN path expects a single k step"
        sa, ba = scale_bias
        sa = jnp.pad(sa.astype(jnp.float32), ((0, 0), (0, Kp - K)))
        ba = jnp.pad(ba.astype(jnp.float32), ((0, 0), (0, Kp - K)))
        kernel = functools.partial(_mm_bn_stats_1k, tm=tm, m_true=M)
        ins = (a_p, sa, ba, b_p)
        in_specs = [a_spec,
                    pl.BlockSpec((1, tk), lambda j, i, k: (0, k)),
                    pl.BlockSpec((1, tk), lambda j, i, k: (0, k)),
                    b_spec]
        scratch = []
    elif nk == 1:
        kernel = _mm_stats_1k
        ins = (a_p, b_p)
        in_specs = [a_spec, b_spec]
        scratch = []
    else:
        kernel = _mm_stats_mk
        ins = (a_p, b_p)
        in_specs = [a_spec, b_spec]
        scratch = [pltpu.VMEM((tm, tn), jnp.float32)]

    out, ssum, ssq = pl.pallas_call(
        kernel,
        out_shape=out_shape,
        grid_spec=pltpu.PrefetchScalarGridSpec(
            num_scalar_prefetch=0,
            grid=grid,
            in_specs=in_specs,
            out_specs=out_specs,
            scratch_shapes=scratch),
        compiler_params=pltpu.CompilerParams(
            dimension_semantics=("parallel", "parallel", "arbitrary"),
            vmem_limit_bytes=VMEM_LIMIT),
        cost_estimate=pl.CostEstimate(
            flops=2 * Mp * Np * Kp,
            transcendentals=0,
            bytes_accessed=2 * (Mp * Kp + Kp * Np + Mp * Np)),
    )(*ins)
    return out[:M, :N], ssum[:, 0, :N], ssq[:, 0, :N]


# --------------------------------------------------------------------------
# BN scale/shift epilogues (reduce the per-row-tile partial stats in-kernel)
# --------------------------------------------------------------------------

def _bn_scale(s, q, g, b, inv_rows):
    # s, q: (R, N) per-row-tile partials -> reduce, then mu / scale.
    # NOTE: E[x^2]-E[x]^2 in f32; fine at these magnitudes (clamped at 0).
    s = jnp.sum(s, axis=0, keepdims=True)
    q = jnp.sum(q, axis=0, keepdims=True)
    mu = s * inv_rows
    var = jnp.maximum(q * inv_rows - mu * mu, 0.0)   # biased variance (BN train)
    scale = jax.lax.rsqrt(var + BN_EPS) * g
    return mu, scale, b


def _norm_act_kernel(y_ref, s_ref, q_ref, g_ref, b_ref, o_ref, *, rows, relu):
    mu, sc, bb = _bn_scale(s_ref[...], q_ref[...], g_ref[...], b_ref[...], 1.0 / rows)
    y = (y_ref[...].astype(jnp.float32) - mu) * sc + bb
    if relu:
        y = jnp.maximum(y, 0.0)
    o_ref[...] = y.astype(o_ref.dtype)


def _bn_add_relu_kernel(y_ref, s_ref, q_ref, g_ref, b_ref, r_ref, o_ref, *, rows):
    mu, sc, bb = _bn_scale(s_ref[...], q_ref[...], g_ref[...], b_ref[...], 1.0 / rows)
    y = (y_ref[...].astype(jnp.float32) - mu) * sc + bb
    o_ref[...] = jnp.maximum(y + r_ref[...].astype(jnp.float32), 0.0).astype(o_ref.dtype)


def _bn2_add_relu_kernel(y_ref, s_ref, q_ref, g_ref, b_ref,
                         y2_ref, s2_ref, q2_ref, g2_ref, b2_ref, o_ref, *, rows):
    inv = 1.0 / rows
    mu, sc, bb = _bn_scale(s_ref[...], q_ref[...], g_ref[...], b_ref[...], inv)
    a = (y_ref[...].astype(jnp.float32) - mu) * sc + bb
    mu2, sc2, bb2 = _bn_scale(s2_ref[...], q2_ref[...], g2_ref[...], b2_ref[...], inv)
    d = (y2_ref[...].astype(jnp.float32) - mu2) * sc2 + bb2
    o_ref[...] = jnp.maximum(a + d, 0.0).astype(o_ref.dtype)


def _call_rowwise(kernel, args, row_flags, M, N, out_dtype=jnp.bfloat16):
    """Tile all `row_flags==1` (M,N) operands over rows; broadcast the rest."""
    n_row = sum(row_flags)
    cap = 512 if n_row >= 2 else 1024      # keep dual-operand kernels v7x-safe
    tmm = min(cap, _round_up(M, 16))
    Mp = _round_up(M, tmm)
    ins, specs = [], []
    for a, is_row in zip(args, row_flags):
        if is_row:
            if Mp != M:
                a = jnp.pad(a, ((0, Mp - M), (0, 0)))
            ins.append(a)
            specs.append(pl.BlockSpec((tmm, N), lambda i: (i, 0)))
        else:
            ins.append(a)
            shp = tuple(a.shape)
            specs.append(pl.BlockSpec(shp, lambda i, nd=len(shp): (0,) * nd))
    out = pl.pallas_call(
        kernel,
        out_shape=jax.ShapeDtypeStruct((Mp, N), out_dtype),
        grid_spec=pltpu.PrefetchScalarGridSpec(
            num_scalar_prefetch=0,
            grid=(Mp // tmm,),
            in_specs=specs,
            out_specs=pl.BlockSpec((tmm, N), lambda i: (i, 0))),
        compiler_params=pltpu.CompilerParams(
            dimension_semantics=("parallel",),
            vmem_limit_bytes=VMEM_LIMIT),
    )(*ins)
    return out[:M]


@functools.partial(jax.jit, static_argnames=("relu",))
def bn_apply(y, ssum, ssq, gamma, beta, relu=True):
    M, N = y.shape
    k = functools.partial(_norm_act_kernel, rows=M, relu=relu)
    return _call_rowwise(k, [y, ssum, ssq, gamma, beta], [1, 0, 0, 0, 0], M, N)


@jax.jit
def bn_add_relu(y, ssum, ssq, gamma, beta, residual):
    M, N = y.shape
    k = functools.partial(_bn_add_relu_kernel, rows=M)
    return _call_rowwise(k, [y, ssum, ssq, gamma, beta, residual],
                         [1, 0, 0, 0, 0, 1], M, N)


@jax.jit
def bn2_add_relu(y, s, q, g, b, y2, s2, q2, g2, b2):
    M, N = y.shape
    k = functools.partial(_bn2_add_relu_kernel, rows=M)
    return _call_rowwise(k, [y, s, q, g, b, y2, s2, q2, g2, b2],
                         [1, 0, 0, 0, 0, 1, 0, 0, 0, 0], M, N)


def _bn_fold(ssum, ssq, gamma, beta, rows):
    """Reduce per-row-tile partials to the (scale, bias) folded BN form used by
    the fused A-side BN matmul: y_bn = y*sa + ba (tiny (R,N) glue arrays)."""
    s = jnp.sum(ssum, axis=0, keepdims=True)
    q = jnp.sum(ssq, axis=0, keepdims=True)
    mu = s / rows
    var = jnp.maximum(q / rows - mu * mu, 0.0)
    sa = gamma * jax.lax.rsqrt(var + BN_EPS)
    return sa, beta - mu * sa


# --------------------------------------------------------------------------
# MaxPool 3x3 / stride 2 / pad 1 — tap-major layout, row-tiled
# TODO(synk): gather the 9 taps in-kernel from the padded activation to avoid
# materializing the (9, M, C) tap array in HBM (strided sublane selection).
# --------------------------------------------------------------------------

def _maxpool_kernel(p_ref, o_ref):
    r = p_ref[0]
    for t in range(1, 9):
        r = jnp.maximum(r, p_ref[t])
    o_ref[...] = r


@jax.jit
def maxpool2d_3x3_s2(x):
    N, H, W, C = x.shape
    xp = jnp.pad(x, ((0, 0), (1, 1), (1, 1), (0, 0)), constant_values=-jnp.inf)
    Ho, Wo = _conv_out_hw(H, W, 3, 3, 2, 1)
    taps = [xp[:, dy:dy + Ho * 2:2, dx:dx + Wo * 2:2, :]
            for dy in range(3) for dx in range(3)]
    M = N * Ho * Wo
    pat = jnp.stack(taps, axis=0).reshape(9, M, C)
    tmm = min(512, _round_up(M, 16))
    Mp = _round_up(M, tmm)
    if Mp != M:
        pat = jnp.pad(pat, ((0, 0), (0, Mp - M), (0, 0)))
    out = pl.pallas_call(
        _maxpool_kernel,
        out_shape=jax.ShapeDtypeStruct((Mp, C), x.dtype),
        grid_spec=pltpu.PrefetchScalarGridSpec(
            num_scalar_prefetch=0,
            grid=(Mp // tmm,),
            in_specs=[pl.BlockSpec((9, tmm, C), lambda i: (0, i, 0))],
            out_specs=pl.BlockSpec((tmm, C), lambda i: (i, 0))),
        compiler_params=pltpu.CompilerParams(
            dimension_semantics=("parallel",),
            vmem_limit_bytes=VMEM_LIMIT),
    )(pat)
    return out[:M].reshape(N, Ho, Wo, C)


# --------------------------------------------------------------------------
# Classifier head: avgpool -> Linear -> BatchNorm1d -> Linear -> Softmax
# --------------------------------------------------------------------------

def _head_kernel(feat_ref, w1_ref, b1_ref, g_ref, be_ref, w2_ref, b2_ref, o_ref):
    hw = feat_ref.shape[1]
    x = jnp.sum(feat_ref[...].astype(jnp.float32), axis=1) * (1.0 / hw)   # (N, 2048)
    h = jnp.dot(x, w1_ref[...], preferred_element_type=jnp.float32) + b1_ref[...]
    mu = jnp.mean(h, axis=0, keepdims=True)
    var = jnp.mean((h - mu) ** 2, axis=0, keepdims=True)
    hn = (h - mu) * jax.lax.rsqrt(var + BN_EPS) * g_ref[...] + be_ref[...]
    logits = jnp.dot(hn, w2_ref[...], preferred_element_type=jnp.float32) + b2_ref[...]
    m = jnp.max(logits, axis=-1, keepdims=True)
    e = jnp.exp(logits - m)
    o_ref[...] = e / jnp.sum(e, axis=-1, keepdims=True)


@jax.jit
def classifier_head(feat, w1, b1, g, be, w2, b2):
    # TODO(synk): BatchNorm1d batch stats are computed in one un-tiled kernel;
    # fine for small batch*seq, would need cross-tile stats for large batches.
    N = feat.shape[0]
    C = w2.shape[1]
    return pl.pallas_call(
        _head_kernel,
        out_shape=jax.ShapeDtypeStruct((N, C), jnp.float32),
        compiler_params=pltpu.CompilerParams(vmem_limit_bytes=VMEM_LIMIT),
    )(feat, w1, b1, g, be, w2, b2)


# --------------------------------------------------------------------------
# Conv / backbone glue (im2col in bf16 + fused matmul-with-stats)
# TODO(synk): the kh>1 path still materializes the im2col patches in HBM;
# in-kernel tap gathering (offset windows of the padded NHWC activation) would
# remove that traffic but is not expressible with blocked index_maps at
# stride 2 without risky unblocked indexing.
# --------------------------------------------------------------------------

@functools.partial(jax.jit, static_argnames=("stride", "pad"))
def conv2d(x, w, *, stride=1, pad=0):
    """NHWC conv with PyTorch OIHW weights (bias-free ResNet convs).

    Returns (y2d[M, Cout] bf16, part_sum[R, Cout] f32, part_sumsq[R, Cout] f32)."""
    N, H, W, Cin = x.shape
    Cout, _, kh, kw = w.shape
    x = x.astype(jnp.bfloat16)
    if pad:
        x = jnp.pad(x, ((0, 0), (pad, pad), (pad, pad), (0, 0)))
    Ho, Wo = _conv_out_hw(H, W, kh, kw, stride, pad)
    if kh == 1 and kw == 1 and stride == 1:
        patches = x.reshape(N * H * W, Cin)
    else:
        cols = [x[:, dy:dy + Ho * stride:stride, dx:dx + Wo * stride:stride, :]
                for dy in range(kh) for dx in range(kw)]
        patches = jnp.concatenate(cols, axis=-1).reshape(N * Ho * Wo, kh * kw * Cin)
    w2 = jnp.transpose(w, (2, 3, 1, 0)).reshape(kh * kw * Cin, Cout).astype(jnp.bfloat16)
    return conv_matmul_stats(patches, w2)


@jax.jit
def conv1x1_bn_relu_matmul(y, w, sa, ba):
    """1x1 conv whose input `y` (M, Cin) is a pre-BN activation: BN scale/bias
    + ReLU of the previous conv are applied to the A tile inside the matmul."""
    Cout, Cin = w.shape[0], w.shape[1]
    w2 = w.reshape(Cout, Cin).T                      # (Cin, Cout)
    return conv_matmul_stats(y, w2, scale_bias=(sa, ba))


def bottleneck(x, blk, stride):
    N, H, W, Cin = x.shape
    width = blk["w1"].shape[0]
    cout = blk["w3"].shape[0]

    y1, s1, q1 = conv2d(x, blk["w1"], stride=1, pad=0)
    # conv2 is 3x3 with zero spatial padding: BN must be applied *before* that
    # padding, so y1 is materialized post-BN here.
    y1 = bn_apply(y1, s1, q1, blk["g1"], blk["b1"], relu=True).reshape(N, H, W, width)

    y2, s2, q2 = conv2d(y1, blk["w2"], stride=stride, pad=1)
    H2, W2 = _conv_out_hw(H, W, 3, 3, stride, 1)

    # BN2 + ReLU is folded into the A-load of conv3 (1x1, no spatial padding):
    # one full HBM activation write + read removed per bottleneck.
    sa2, ba2 = _bn_fold(s2, q2, blk["g2"], blk["b2"], y2.shape[0])
    y3, s3, q3 = conv1x1_bn_relu_matmul(y2, blk["w3"], sa2, ba2)

    if "wd" in blk:
        yd, sd, qd = conv2d(x, blk["wd"], stride=stride, pad=0)
        out = bn2_add_relu(y3, s3, q3, blk["g3"], blk["b3"],
                           yd, sd, qd, blk["gd"], blk["bd"])
    else:
        out = bn_add_relu(y3, s3, q3, blk["g3"], blk["b3"],
                          x.reshape(N * H * W, Cin))
    return out.reshape(N, H2, W2, cout)


def resnet50_features(x, p):
    N, H, W, _ = x.shape
    y, s, q = conv2d(x, p["conv1"], stride=2, pad=3)
    H, W = _conv_out_hw(H, W, 7, 7, 2, 3)
    y = bn_apply(y, s, q, p["bn1_g"], p["bn1_b"], relu=True).reshape(N, H, W, 64)
    y = maxpool2d_3x3_s2(y)
    strides = (1, 2, 2, 2)
    for li, layer in enumerate(p["layers"]):
        for bi, blk in enumerate(layer):
            y = bottleneck(y, blk, strides[li] if bi == 0 else 1)
    return y  # (N, h, w, 2048) bf16


def conv_classifier_forward(x, params):
    # x: (B, S, C, H, W) float32 (PyTorch NCHW convention per frame)
    # NOTE: activations run in bf16 (f32 accumulation / BN math) vs f32 in the
    # PyTorch reference -> expect ~1e-2-level deviations in probabilities.
    B, S, C, H, W = x.shape
    xi = x.reshape(B * S, C, H, W).transpose(0, 2, 3, 1).astype(jnp.bfloat16)
    fmap = resnet50_features(xi, params["backbone"])      # (B*S, h, w, 2048)
    N, h, w, F = fmap.shape
    feat = fmap.reshape(N, h * w, F)
    hd = params["head"]
    probs = classifier_head(feat, hd["w1"], hd["b1"], hd["g"], hd["beta"],
                            hd["w2"], hd["b2"])
    return probs.reshape(B, S, -1)


# --------------------------------------------------------------------------
# Deterministic parameter init (synthetic, exact ResNet-50 shapes)
# --------------------------------------------------------------------------

def init_params(key, num_classes, latent_dim):
    # TODO(synk): pretrained torchvision checkpoints cannot be loaded here;
    # weights are deterministic synthetic inits with the exact ResNet-50 shapes.
    keys = [key]

    def nk():
        keys[0], sub = jax.random.split(keys[0])
        return sub

    def conv_w(cout, cin, kh, kw):
        std = math.sqrt(2.0 / (cin * kh * kw))
        return jax.random.normal(nk(), (cout, cin, kh, kw), jnp.float32) * std

    def bn(c):
        return jnp.ones((1, c), jnp.float32), jnp.zeros((1, c), jnp.float32)

    backbone = {"conv1": conv_w(64, 3, 7, 7)}
    backbone["bn1_g"], backbone["bn1_b"] = bn(64)

    layers = []
    in_ch = 64
    for width, nblocks, stride in [(64, 3, 1), (128, 4, 2), (256, 6, 2), (512, 3, 2)]:
        blocks = []
        for bi in range(nblocks):
            s = stride if bi == 0 else 1
            blk = {"w1": conv_w(width, in_ch, 1, 1),
                   "w2": conv_w(width, width, 3, 3),
                   "w3": conv_w(width * 4, width, 1, 1)}
            blk["g1"], blk["b1"] = bn(width)
            blk["g2"], blk["b2"] = bn(width)
            blk["g3"], blk["b3"] = bn(width * 4)
            if s != 1 or in_ch != width * 4:
                blk["wd"] = conv_w(width * 4, in_ch, 1, 1)
                blk["gd"], blk["bd"] = bn(width * 4)
            blocks.append(blk)
            in_ch = width * 4
        layers.append(blocks)
    backbone["layers"] = layers

    feat_dim = 512 * 4  # resnet.fc.in_features

    def lin(fan_in, fan_out):
        bound = 1.0 / math.sqrt(fan_in)
        w = jax.random.uniform(nk(), (fan_in, fan_out), jnp.float32, -bound, bound)
        b = jax.random.uniform(nk(), (1, fan_out), jnp.float32, -bound, bound)
        return w, b

    w1, b1 = lin(feat_dim, latent_dim)
    w2, b2 = lin(latent_dim, num_classes)
    g, beta = bn(latent_dim)
    head = {"w1": w1, "b1": b1, "g": g, "beta": beta, "w2": w2, "b2": b2}
    return {"backbone": backbone, "head": head}


# --------------------------------------------------------------------------

if __name__ == "__main__":
    num_classes, latent_dim = 5, 32
    B, S, C, H, W = 2, 2, 3, 64, 64

    key = jax.random.PRNGKey(0)
    pkey, xkey = jax.random.split(key)
    params = init_params(pkey, num_classes, latent_dim)
    x = jax.random.normal(xkey, (B, S, C, H, W), jnp.float32)

    fwd = jax.jit(conv_classifier_forward)   # fuse all glue (pads/slices/reshapes)
    out = fwd(x, params)
    out = jax.block_until_ready(out)

    assert out.shape == (B, S, num_classes), out.shape
    assert bool(jnp.all(jnp.isfinite(out)))
    assert bool(jnp.allclose(jnp.sum(out, axis=-1), 1.0, atol=1e-4))
    print("KERNEL_OK")
</pallas_src>

<mosaic_0001>
module attributes {stable_mosaic.version = 11 : i64} {
  func.func @_mm_stats_1k(%arg0: i32, %arg1: i32, %arg2: i32, %arg3: memref<512x256xbf16, #tpu.memory_space<vmem>>, %arg4: memref<256x64xbf16, #tpu.memory_space<vmem>>, %arg5: memref<512x64xbf16, #tpu.memory_space<vmem>>, %arg6: memref<1x1x64xf32, #tpu.memory_space<vmem>>, %arg7: memref<1x1x64xf32, #tpu.memory_space<vmem>>) attributes {dimension_semantics = [#tpu.dimension_semantics<parallel>, #tpu.dimension_semantics<parallel>, #tpu.dimension_semantics<arbitrary>], iteration_bounds = array<i64: 1, 8, 1>, scalar_prefetch = 0 : i64, scratch_operands = 0 : i64, tpu.core_type = #tpu.core_type<tc>, window_params = [{transform_indices = @transform_0, window_bounds = array<i64: 512, 256>}, {transform_indices = @transform_1, window_bounds = array<i64: 256, 64>}, {transform_indices = @transform_2, window_bounds = array<i64: 512, 64>}, {transform_indices = @transform_3, window_bounds = array<i64: 1, 1, 64>}, {transform_indices = @transform_4, window_bounds = array<i64: 1, 1, 64>}]} {
    %c0 = arith.constant 0 : index
    %c0_0 = arith.constant 0 : index
    %0 = vector.load %arg3[%c0, %c0_0] : memref<512x256xbf16, #tpu.memory_space<vmem>>, vector<512x256xbf16>
    %c0_1 = arith.constant 0 : index
    %c0_2 = arith.constant 0 : index
    %1 = vector.load %arg4[%c0_1, %c0_2] : memref<256x64xbf16, #tpu.memory_space<vmem>>, vector<256x64xbf16>
    %cst = arith.constant dense<0.000000e+00> : vector<512x64xf32>
    %2 = tpu.matmul %0, %1, %cst {dimension_numbers = #tpu.dot_dimension_numbers<[1], [0], [0], [1], [0, 0, 1, 1], [], []>} : vector<512x256xbf16>, vector<256x64xbf16>, vector<512x64xf32> -> vector<512x64xf32>
    %3 = arith.truncf %2 : vector<512x64xf32> to vector<512x64xbf16>
    %c0_3 = arith.constant 0 : index
    %c0_4 = arith.constant 0 : index
    %4 = vector.load %arg5[%c0_3, %c0_4] : memref<512x64xbf16, #tpu.memory_space<vmem>>, vector<512x64xbf16>
    tpu.vector_store %arg5[%c0_3, %c0_4], %3 {strides = array<i32>} : memref<512x64xbf16, #tpu.memory_space<vmem>>, vector<512x64xbf16>,
    %cst_5 = arith.constant dense<0.000000e+00> : vector<64xf32>
    %5 = vector.multi_reduction <add>, %2, %cst_5 [0] : vector<512x64xf32> to vector<64xf32>
    %6 = vector.shape_cast %5 : vector<64xf32> to vector<1x64xf32>
    %7 = vector.shape_cast %6 : vector<1x64xf32> to vector<1x1x64xf32>
    %c0_6 = arith.constant 0 : index
    %c0_7 = arith.constant 0 : index
    %c0_8 = arith.constant 0 : index
    %8 = vector.load %arg6[%c0_6, %c0_7, %c0_8] : memref<1x1x64xf32, #tpu.memory_space<vmem>>, vector<1x1x64xf32>
    tpu.vector_store %arg6[%c0_6, %c0_7, %c0_8], %7 {strides = array<i32>} : memref<1x1x64xf32, #tpu.memory_space<vmem>>, vector<1x1x64xf32>,
    %9 = arith.mulf %2, %2 : vector<512x64xf32>
    %cst_9 = arith.constant dense<0.000000e+00> : vector<64xf32>
    %10 = vector.multi_reduction <add>, %9, %cst_9 [0] : vector<512x64xf32> to vector<64xf32>
    %11 = vector.shape_cast %10 : vector<64xf32> to vector<1x64xf32>
    %12 = vector.shape_cast %11 : vector<1x64xf32> to vector<1x1x64xf32>
    %c0_10 = arith.constant 0 : index
    %c0_11 = arith.constant 0 : index
    %c0_12 = arith.constant 0 : index
    %13 = vector.load %arg7[%c0_10, %c0_11, %c0_12] : memref<1x1x64xf32, #tpu.memory_space<vmem>>, vector<1x1x64xf32>
    tpu.vector_store %arg7[%c0_10, %c0_11, %c0_12], %12 {strides = array<i32>} : memref<1x1x64xf32, #tpu.memory_space<vmem>>, vector<1x1x64xf32>,
    return
  }
  func.func @transform_0(%arg0: i32, %arg1: i32, %arg2: i32) -> (i32, i32) {
    %c0_i32 = arith.constant 0 : i32
    return %arg1, %arg2 : i32, i32
  }
  func.func @transform_1(%arg0: i32, %arg1: i32, %arg2: i32) -> (i32, i32) {
    %c0_i32 = arith.constant 0 : i32
    return %arg2, %arg0 : i32, i32
  }
  func.func @transform_2(%arg0: i32, %arg1: i32, %arg2: i32) -> (i32, i32) {
    %c0_i32 = arith.constant 0 : i32
    return %arg1, %arg0 : i32, i32
  }
  func.func @transform_3(%arg0: i32, %arg1: i32, %arg2: i32) -> (i32, i32, i32) {
    %c0_i32 = arith.constant 0 : i32
    %c0_i32_0 = arith.constant 0 : i32
    return %arg1, %c0_i32, %arg0 : i32, i32, i32
  }
  func.func @transform_4(%arg0: i32, %arg1: i32, %arg2: i32) -> (i32, i32, i32) {
    %c0_i32 = arith.constant 0 : i32
    %c0_i32_0 = arith.constant 0 : i32
    return %arg1, %c0_i32, %arg0 : i32, i32, i32
  }
}

</mosaic_0001>

<bundles_post_ra>
// kernel: conv2d.1
= control target key start
LH: loop header
LB: loop body
LE: loop exit
PB: predicated region body
PF: predicated region fallthrough
CT: control target
= control target key end

     0   :  { %10 = vsyncpa [#allocation3], 0  ;;  %s3283_s0 = inlined_call_operand.vmem [shape: bf16[4096,256], index: 0, kind: input, shape index: {}]   ;;  %s3284_s1 = inlined_call_operand.vmem [shape: bf16[256,64], index: 1, kind: input, shape index: {}]   ;;  %s3285_s2 = inlined_call_operand.vmem [shape: bf16[4096,64], index: 2, kind: output, shape index: {0}]   ;;  %s3286_s3 = inlined_call_operand.hbm [shape: f32[8,1,64], index: 3, kind: output, shape index: {1}]   ;;  %s3287_s4 = inlined_call_operand.hbm [shape: f32[8,1,64], index: 4, kind: output, shape index: {2}]  }
   0x1   :  { %12 = vsyncpa [#allocation3 + $0x1], 0 }
   0x2   :  { %13 = vsyncpa [#allocation5], 0 }
   0x3   :  { %15 = vsyncpa [#allocation5 + $0x1], 0  ;;  %s2439_s15 = smov 0   ;;  %s2441_s16 = smov 0  }
   0x4   :  { %s2443_s17 = smov 0   ;;  %s2445_s18 = smov 0  }
   0x5   :  { %s2447_s19 = smov 0   ;;  %s2449_s20 = smov 0  }
   0x6 LB: > { %s1812_s21 = sadd.s32 4294967295, %s2412_s20   ;;  %s1813_s22 = sadd.s32 4294967294, %s2412_s20   ;;  %s2412_s20 = sphi %s2449_s20, %s21_s20   ;;  %s2408_s19 = sphi %s2447_s19, %s3294_s19   ;;  %s2404_s18 = sphi %s2445_s18, %s3293_s18   ;;  %s2400_s17 = sphi %s2443_s17, %s3292_s17   ;;  %s2396_s16 = sphi %s2441_s16, %s3291_s16   ;;  %s2392_s15 = sphi %s2439_s15, %s3290_s15  }
   0x7   : > { %s36_s23 = sadd.s32 1, %s2408_s19  ;;  %s133_s24 = sadd.s32 1, %s2400_s17 }
   0x8   : > { %p38_p0 = scmp.ge.s32.totalorder %s36_s23, 8  ;;  %p143_p1 = scmp.ne.s32.totalorder %s2400_s17, %s2396_s16 }
   0x9   : > { %p144_p2 = scmp.eq.s32.totalorder %s1812_s21, 7  ;;  %p149_p3 = scmp.ne.s32.totalorder %s2396_s16, %s2392_s15 }
   0xa   : > { %s3296_s23 = smov (%p38_p0, %s36_s23), 0  ;;  %p150_p5 = scmp.eq.s32.totalorder %s1813_s22, 7 }
   0xb   : > { %p2479_p4 = por %p144_p2, %p143_p1  ;;  %s128_s26 = ssub.s32 %s2408_s19, %s3296_s23 }
   0xc   : > { %p1817_p6 = scmp.ge.s32.totalorder %s2412_s20, 1  ;;  %p131_p7 = scmp.eq.s32.totalorder %s128_s26, 0 }
   0xd   : > { %p2486_p8 = por %p150_p5, %p149_p3  ;;  %p223_p9 = scmp.lt.s32.totalorder %s2412_s20, 9 }
   0xe   : > { %s2492_s28 = scalar_select %p131_p7, %s2400_s17, %s133_s24  }
   0xf   : > { %p224_p10 = pnand %p1817_p6, %p223_p9 }
  0x10   : > { %s1818_s21 = sshll.u32 (!%p224_p10), %s2404_s18, 6  ;;  %s1642_s22 = scalar_lea.hbm (!%p224_p10), %s3286_s3, %s2404_s18 }
  0x11   : > { %227 = sbr.rel (%p224_p10) target bundleno = 525 (0x20d), region = 28  ;;  %p275_p11 = scmp.lt.s32.totalorder (!%p224_p10), %s1818_s21, 511 }
  0x12   : > { %s1656_s29 = scalar_lea.hbm (!%p224_p10), %s3287_s4, %s2404_s18  ;;  %s3220_s6 = sshll.u32 (!%p224_p10), %s1642_s22, 4  ;;  %s1647_s6 = int_to_ptr.hbm [resolvable:$true] %s3220_s6 }
  0x13   : > { %s2316_s10 = sshra.s32 (!%p224_p10), %s1647_s6, 4  ;;  %s2322_s14 = scalar_lea.hbm (!%p224_p10), %s3286_s3, 8  ;;  %s2317_s10 = int_to_ptr.hbm [resolvable:$true] %s2316_s10 }
  0x14   : > { %s2318_s11 = scalar_lea.hbm (!%p224_p10), %s2317_s10, 1  ;;  %p2323_p1 = scmp.lt.s32.totalorder (!%p224_p10), %s2317_s10, %s3286_s3 }
  0x15   : > { %p2319_p12 = scmp.ne.s32.totalorder (!%p224_p10), %s2317_s10, %s2318_s11  ;;  %p2324_p2 = scmp.lt.s32.totalorder (!%p224_p10), %s2322_s14, %s2318_s11 }
  0x16   : > { %v2217_v0 = vld [vmem:[%s3284_s1 + $0x38] sm:$0xff]  ;;  %v2216_v2 = vld [vmem:[%s3284_s1 + $0x30] sm:$0xff]  ;;  %v2215_v4 = vld [vmem:[%s3284_s1 + $0x28] sm:$0xff]  ;;  %s3298_s21 = smov (!%p275_p11, %s1818_s21), 511  ;;  %vm1217_vm0 = vcmask 519168   ;;  %vm1282_vm1 = vcmask 523264  }
  0x17   : > { %v2225_v1 = vld [vmem:[%s3284_s1 + $0x78] sm:$0xff]  ;;  %815 = vmatpush.bf16.msra.mxu0 %v2217_v0  ;;  %v2224_v3 = vld [vmem:[%s3284_s1 + $0x70] sm:$0xff]  ;;  %2226 = vmatpush.bf16.msra.mxu2 %v2217_v0  ;;  %v2223_v5 = vld [vmem:[%s3284_s1 + $0x68] sm:$0xff]  ;;  %s2145_s12 = sshll.u32 %s3298_s21, 3  ;;  %s1822_s9 = sshll.u32 %s3298_s21, 2  ;;  %vm1416_vm2 = vcmask 516096  }
  0x18   : > { %984 = vmatpush.bf16.msra.mxu1 %v2225_v1  ;;  %2234 = vmatpush.bf16.msra.mxu3 %v2225_v1  ;;  %v2214_v6 = vld [vmem:[%s3284_s1 + $0x20] sm:$0xff]  ;;  %v2213_v8 = vld [vmem:[%s3284_s1 + $0x18] sm:$0xff]  ;;  %v2212_v10 = vld [vmem:[%s3284_s1 + $0x10] sm:$0xff]  ;;  %s2543_s30 = scalar_lea.vmem %s3283_s0, %s2145_s12  ;;  %s2619_s12 = scalar_lea.vmem %s3285_s2, %s1822_s9 }
  0x19   : > { %v2222_v7 = vld [vmem:[%s3284_s1 + $0x60] sm:$0xff]  ;;  %v2221_v9 = vld [vmem:[%s3284_s1 + $0x58] sm:$0xff]  ;;  %v2220_v11 = vld [vmem:[%s3284_s1 + $0x50] sm:$0xff]  ;;  %s3207_s21 = sand.u32 1, %s2396_s16   ;;  %s3225_s9 = sshll.u32 %s1656_s29, 4  ;;  %s1661_s9 = int_to_ptr.hbm [resolvable:$true] %s3225_s9 }
  0x1a   : > { %v2211_v12 = vld [vmem:[%s3284_s1 + $0x8] sm:$0xff]  ;;  %v2210_v14 = vld [vmem:[%s3284_s1] sm:$0xff]  ;;  %v1833_v22 = vld [vmem:[%s2543_s30 + $0x10] sm:$0xf]  ;;  %s272_s7 = scalar_lea.vmem [#allocation4], %s3207_s21  ;;  %s1625_s18 = scalar_lea.sflag [#allocation3], %s3207_s21 }
  0x1b   : > { %816 = vmatpush.bf16.msra.mxu0 %v2216_v2  ;;  %2227 = vmatpush.bf16.msra.mxu2 %v2216_v2  ;;  %v2219_v13 = vld [vmem:[%s3284_s1 + $0x48] sm:$0xff]  ;;  %v2218_v15 = vld [vmem:[%s3284_s1 + $0x40] sm:$0xff]  ;;  %v2149_v23 = vld [vmem:[%s2543_s30 + $0x14] sm:$0xf0]  ;;  %s3223_s8 = sshll.u32 %s272_s7, 4  ;;  %p2320_p13 = pnand %p2319_p12, %p2479_p4  ;;  %s1659_s8 = int_to_ptr.vmem [resolvable:$true] %s3223_s8 }
  0x1c   : > { %985 = vmatpush.bf16.msra.mxu1 %v2224_v3  ;;  %2235 = vmatpush.bf16.msra.mxu3 %v2224_v3  ;;  %v1825_v16 = vld [vmem:[%s2543_s30] sm:$0xf]  ;;  %v2147_v17 = vld [vmem:[%s2543_s30 + $0x4] sm:$0xf0]  ;;  %v2146_v18 = vld [vmem:[%s2543_s30 + $0x4] sm:$0xf]  ;;  %v1834_v26 = vor.u32 %v2149_v23, %v1833_v22  ;;  %p2325_p3 = por %p2324_p2, %p2323_p1 }
  0x1d   : > { %v1827_v19 = vld [vmem:[%s2543_s30 + $0x8] sm:$0xf0]  ;;  %v1826_v20 = vor.u32 %v2147_v17, %v1825_v16  ;;  %v2148_v24 = vld [vmem:[%s2543_s30 + $0x14] sm:$0xf]  ;;  %v1835_v25 = vld [vmem:[%s2543_s30 + $0x18] sm:$0xf0]  ;;  %p2321_p0 = pneg %p2320_p13 }
  0x1e   : > { %v1830_v21 = vor.u32 %v2146_v18, %v1827_v19  ;;  %v1838_v27 = vor.u32 %v2148_v24, %v1835_v25  ;;  %v1953_v28 = vld [vmem:[%s2543_s30 + $0x100] sm:$0xf]  ;;  %v2179_v29 = vld [vmem:[%s2543_s30 + $0x104] sm:$0xf0]  ;;  %v2178_v30 = vld [vmem:[%s2543_s30 + $0x104] sm:$0xf] }
  0x1f   : > { %817 = vmatpush.bf16.msra.mxu0 %v2215_v4  ;;  %2228 = vmatpush.bf16.msra.mxu2 %v2215_v4  ;;  %v1954_v31 = vor.u32 %v2179_v29, %v1953_v28  ;;  %v1955_v32 = vld [vmem:[%s2543_s30 + $0x108] sm:$0xf0]  ;;  %v1841_v34 = vld [vmem:[%s2543_s30 + $0x20] sm:$0xf]  ;;  %v2151_v35 = vld [vmem:[%s2543_s30 + $0x24] sm:$0xf0]  ;;  %p2326_p5 = pnand %p2325_p3, %p2321_p0 }
  0x20   : > { %986 = vmatpush.bf16.msra.mxu1 %v2223_v5  ;;  %2236 = vmatpush.bf16.msra.mxu3 %v2223_v5  ;;  %v1958_v33 = vor.u32 %v2178_v30, %v1955_v32  ;;  %v2150_v36 = vld [vmem:[%s2543_s30 + $0x24] sm:$0xf]  ;;  %v1843_v37 = vld [vmem:[%s2543_s30 + $0x28] sm:$0xf0]  ;;  %v1842_v38 = vor.u32 %v2151_v35, %v1841_v34  ;;  %v1961_v40 = vld [vmem:[%s2543_s30 + $0x110] sm:$0xf] }
  0x21   : > { %v1846_v39 = vor.u32 %v2150_v36, %v1843_v37  ;;  %v2181_v41 = vld [vmem:[%s2543_s30 + $0x114] sm:$0xf0]  ;;  %v2180_v42 = vld [vmem:[%s2543_s30 + $0x114] sm:$0xf]  ;;  %v1963_v44 = vld [vmem:[%s2543_s30 + $0x118] sm:$0xf0] }
  0x22   : > { %v1962_v43 = vor.u32 %v2181_v41, %v1961_v40  ;;  %v1966_v45 = vor.u32 %v2180_v42, %v1963_v44  ;;  %v1849_v46 = vld [vmem:[%s2543_s30 + $0x30] sm:$0xf]  ;;  %v2153_v47 = vld [vmem:[%s2543_s30 + $0x34] sm:$0xf0]  ;;  %v2152_v48 = vld [vmem:[%s2543_s30 + $0x34] sm:$0xf] }
  0x23   : > { %818 = vmatpush.bf16.msra.mxu0 %v2214_v6  ;;  %2229 = vmatpush.bf16.msra.mxu2 %v2214_v6  ;;  %v1851_v49 = vld [vmem:[%s2543_s30 + $0x38] sm:$0xf0]  ;;  %v1850_v50 = vor.u32 %v2153_v47, %v1849_v46  ;;  %v1969_v52 = vld [vmem:[%s2543_s30 + $0x120] sm:$0xf]  ;;  %v2183_v53 = vld [vmem:[%s2543_s30 + $0x124] sm:$0xf0] }
  0x24   : > { %987 = vmatpush.bf16.msra.mxu1 %v2222_v7  ;;  %2237 = vmatpush.bf16.msra.mxu3 %v2222_v7  ;;  %v1854_v51 = vor.u32 %v2152_v48, %v1851_v49  ;;  %v2182_v54 = vld [vmem:[%s2543_s30 + $0x124] sm:$0xf]  ;;  %v1970_v55 = vor.u32 %v2183_v53, %v1969_v52  ;;  %v1971_v56 = vld [vmem:[%s2543_s30 + $0x128] sm:$0xf0]  ;;  %v1857_v58 = vld [vmem:[%s2543_s30 + $0x40] sm:$0xf] }
  0x25   : > { %v1974_v57 = vor.u32 %v2182_v54, %v1971_v56  ;;  %v2155_v59 = vld [vmem:[%s2543_s30 + $0x44] sm:$0xf0]  ;;  %v2154_v60 = vld [vmem:[%s2543_s30 + $0x44] sm:$0xf]  ;;  %v1859_v61 = vld [vmem:[%s2543_s30 + $0x48] sm:$0xf0] }
  0x26   : > { %v1858_v62 = vor.u32 %v2155_v59, %v1857_v58  ;;  %v1862_v63 = vor.u32 %v2154_v60, %v1859_v61  ;;  %v1977_v0 = vld [vmem:[%s2543_s30 + $0x130] sm:$0xf]  ;;  %v2185_v1 = vld [vmem:[%s2543_s30 + $0x134] sm:$0xf0]  ;;  %v2184_v2 = vld [vmem:[%s2543_s30 + $0x134] sm:$0xf] }
  0x27   : > { %819 = vmatpush.bf16.msra.mxu0 %v2213_v8  ;;  %2230 = vmatpush.bf16.msra.mxu2 %v2213_v8  ;;  %v1978_v3 = vor.u32 %v2185_v1, %v1977_v0  ;;  %v1979_v4 = vld [vmem:[%s2543_s30 + $0x138] sm:$0xf0]  ;;  %v1865_v6 = vld [vmem:[%s2543_s30 + $0x50] sm:$0xf]  ;;  %v2157_v7 = vld [vmem:[%s2543_s30 + $0x54] sm:$0xf0] }
  0x28   : > { %988 = vmatpush.bf16.msra.mxu1 %v2221_v9  ;;  %2238 = vmatpush.bf16.msra.mxu3 %v2221_v9  ;;  %v1982_v5 = vor.u32 %v2184_v2, %v1979_v4  ;;  %v2156_v8 = vld [vmem:[%s2543_s30 + $0x54] sm:$0xf]  ;;  %v1867_v9 = vld [vmem:[%s2543_s30 + $0x58] sm:$0xf0]  ;;  %v1987_v16 = vld [vmem:[%s2543_s30 + $0x148] sm:$0xf0] }
  0x29   : > { %v1873_v18 = vld [vmem:[%s2543_s30 + $0x60] sm:$0xf]  ;;  %v2159_v19 = vld [vmem:[%s2543_s30 + $0x64] sm:$0xf0]  ;;  %v1993_v24 = vld [vmem:[%s2543_s30 + $0x150] sm:$0xf] }
  0x2a   : > { %v1874_v22 = vor.u32 %v2159_v19, %v1873_v18  ;;  %v2189_v25 = vld [vmem:[%s2543_s30 + $0x154] sm:$0xf0]  ;;  %v1995_v28 = vld [vmem:[%s2543_s30 + $0x158] sm:$0xf0]  ;;  %v1881_v30 = vld [vmem:[%s2543_s30 + $0x70] sm:$0xf] }
  0x2b   : > { %820 = vmatpush.bf16.msra.mxu0 %v2212_v10  ;;  %2231 = vmatpush.bf16.msra.mxu2 %v2212_v10  ;;  %v1866_v10 = vor.u32 %v2157_v7, %v1865_v6  ;;  %v2160_v32 = vld [vmem:[%s2543_s30 + $0x74] sm:$0xf]  ;;  %v2001_v36 = vld [vmem:[%s2543_s30 + $0x160] sm:$0xf]  ;;  %v2191_v37 = vld [vmem:[%s2543_s30 + $0x164] sm:$0xf0] }
  0x2c   : > { %989 = vmatpush.bf16.msra.mxu1 %v2220_v11  ;;  %2239 = vmatpush.bf16.msra.mxu3 %v2220_v11  ;;  %v1870_v11 = vor.u32 %v2156_v8, %v1867_v9  ;;  %v2003_v40 = vld [vmem:[%s2543_s30 + $0x168] sm:$0xf0]  ;;  %v1889_v42 = vld [vmem:[%s2543_s30 + $0x80] sm:$0xf]  ;;  %v2162_v44 = vld [vmem:[%s2543_s30 + $0x84] sm:$0xf] }
  0x2d   : > { %v2193_v52 = vld [vmem:[%s2543_s30 + $0x174] sm:$0xf0]  ;;  %v2192_v53 = vld [vmem:[%s2543_s30 + $0x174] sm:$0xf]  ;;  %v2011_v56 = vld [vmem:[%s2543_s30 + $0x178] sm:$0xf0] }
  0x2e   : > { %v1897_v2 = vld [vmem:[%s2543_s30 + $0x90] sm:$0xf]  ;;  %v2165_v4 = vld [vmem:[%s2543_s30 + $0x94] sm:$0xf0]  ;;  %v1899_v6 = vld [vmem:[%s2543_s30 + $0x98] sm:$0xf0] }
  0x2f   : > { %821 = vmatpush.bf16.msra.mxu0 %v2211_v12  ;;  %2232 = vmatpush.bf16.msra.mxu2 %v2211_v12  ;;  %v1985_v12 = vld [vmem:[%s2543_s30 + $0x140] sm:$0xf] }
  0x30   : > { %990 = vmatpush.bf16.msra.mxu1 %v2219_v13  ;;  %2240 = vmatpush.bf16.msra.mxu3 %v2219_v13  ;;  %v2187_v13 = vld [vmem:[%s2543_s30 + $0x144] sm:$0xf0] }
  0x33   : > { %822 = vmatpush.bf16.msra.mxu0 %v2210_v14  ;;  %2233 = vmatpush.bf16.msra.mxu2 %v2210_v14  ;;  %v2186_v14 = vld [vmem:[%s2543_s30 + $0x144] sm:$0xf] }
  0x34   : > { %991 = vmatpush.bf16.msra.mxu1 %v2218_v15  ;;  %2241 = vmatpush.bf16.msra.mxu3 %v2218_v15  ;;  %v1986_v15 = vor.u32 %v2187_v13, %v1985_v12  ;;  %v1990_v17 = vor.u32 %v2186_v14, %v1987_v16  ;;  %v2195_v16 = vld [vmem:[%s2543_s30 + $0x184] sm:$0xf0] }
  0x36   : > { %823 = vmatmul.bf16.vlgmr.msra.gmra.mxu0 %v1826_v20  ;;  %903 = vmatmul.bf16.vlgmr.msra.gmra.mxu2 %v1954_v31  ;;  %v2158_v20 = vld [vmem:[%s2543_s30 + $0x64] sm:$0xf]  ;;  %v2161_v31 = vld [vmem:[%s2543_s30 + $0x74] sm:$0xf0] }
  0x37   : > { %992 = vmatmul.bf16.vlgmr.msra.gmra.mxu1 %v1830_v21  ;;  %1072 = vmatmul.bf16.vlgmr.msra.gmra.mxu3 %v1958_v33  ;;  %v1875_v21 = vld [vmem:[%s2543_s30 + $0x68] sm:$0xf0]  ;;  %v1883_v33 = vld [vmem:[%s2543_s30 + $0x78] sm:$0xf0]  ;;  %v1882_v34 = vor.u32 %v2161_v31, %v1881_v30 }
  0x38   : > { %v1878_v23 = vor.u32 %v2158_v20, %v1875_v21  ;;  %v1886_v35 = vor.u32 %v2160_v32, %v1883_v33 }
  0x46   : > { %828 = vmatmul.bf16.gmra.mxu0 %v1834_v26  ;;  %908 = vmatmul.bf16.gmra.mxu2 %v1962_v43  ;;  %v1994_v26 = vor.u32 %v2189_v25, %v1993_v24  ;;  %v2163_v43 = vld [vmem:[%s2543_s30 + $0x84] sm:$0xf0] }
  0x47   : > { %997 = vmatmul.bf16.gmra.mxu1 %v1838_v27  ;;  %1077 = vmatmul.bf16.gmra.mxu3 %v1966_v45  ;;  %v2188_v27 = vld [vmem:[%s2543_s30 + $0x154] sm:$0xf]  ;;  %v1891_v45 = vld [vmem:[%s2543_s30 + $0x88] sm:$0xf0]  ;;  %v1890_v46 = vor.u32 %v2163_v43, %v1889_v42 }
  0x48   : > { %v1998_v29 = vor.u32 %v2188_v27, %v1995_v28  ;;  %v1894_v47 = vor.u32 %v2162_v44, %v1891_v45 }
  0x56   : > { %833 = vmatmul.bf16.gmra.mxu0 %v1842_v38  ;;  %913 = vmatmul.bf16.gmra.mxu2 %v1970_v55  ;;  %v2190_v38 = vld [vmem:[%s2543_s30 + $0x164] sm:$0xf] }
  0x57   : > { %1002 = vmatmul.bf16.gmra.mxu1 %v1846_v39  ;;  %1082 = vmatmul.bf16.gmra.mxu3 %v1974_v57  ;;  %v2002_v39 = vor.u32 %v2191_v37, %v2001_v36  ;;  %v2006_v41 = vor.u32 %v2190_v38, %v2003_v40  ;;  %v2014_v57 = vor.u32 %v2192_v53, %v2011_v56  ;;  %v2167_v37 = vld [vmem:[%s2543_s30 + $0xa4] sm:$0xf0]  ;;  %v2166_v38 = vld [vmem:[%s2543_s30 + $0xa4] sm:$0xf]  ;;  %v2197_v56 = vld [vmem:[%s2543_s30 + $0x194] sm:$0xf0] }
  0x66   : > { %838 = vmatmul.bf16.gmra.mxu0 %v1850_v50  ;;  %918 = vmatmul.bf16.gmra.mxu2 %v1978_v3 }
  0x67   : > { %1007 = vmatmul.bf16.gmra.mxu1 %v1854_v51  ;;  %1087 = vmatmul.bf16.gmra.mxu3 %v1982_v5  ;;  %v2009_v51 = vld [vmem:[%s2543_s30 + $0x170] sm:$0xf]  ;;  %v2164_v5 = vld [vmem:[%s2543_s30 + $0x94] sm:$0xf] }
  0x68   : > { %v2010_v55 = vor.u32 %v2193_v52, %v2009_v51  ;;  %v2025_v52 = vld [vmem:[%s2543_s30 + $0x190] sm:$0xf] }
  0x76   : > { %843 = vmatmul.bf16.gmra.mxu0 %v1858_v62  ;;  %923 = vmatmul.bf16.gmra.mxu2 %v1986_v15  ;;  %v2017_v15 = vld [vmem:[%s2543_s30 + $0x180] sm:$0xf] }
  0x77   : > { %1012 = vmatmul.bf16.gmra.mxu1 %v1862_v63  ;;  %1092 = vmatmul.bf16.gmra.mxu3 %v1990_v17  ;;  %v2194_v17 = vld [vmem:[%s2543_s30 + $0x184] sm:$0xf]  ;;  %v2018_v21 = vor.u32 %v2195_v16, %v2017_v15 }
  0x86   : > { %848 = vmatmul.bf16.gmra.mxu0 %v1866_v10  ;;  %928 = vmatmul.bf16.gmra.mxu2 %v1994_v26  ;;  %v1898_v10 = vor.u32 %v2165_v4, %v1897_v2 }
  0x87   : > { %1017 = vmatmul.bf16.gmra.mxu1 %v1870_v11  ;;  %1097 = vmatmul.bf16.gmra.mxu3 %v1998_v29  ;;  %v1902_v11 = vor.u32 %v2164_v5, %v1899_v6 }
  0x96   : > { %853 = vmatmul.bf16.gmra.mxu0 %v1874_v22  ;;  %933 = vmatmul.bf16.gmra.mxu2 %v2002_v39  ;;  %v2019_v22 = vld [vmem:[%s2543_s30 + $0x188] sm:$0xf0] }
  0x97   : > { %1022 = vmatmul.bf16.gmra.mxu1 %v1878_v23  ;;  %1102 = vmatmul.bf16.gmra.mxu3 %v2006_v41  ;;  %v2022_v24 = vor.u32 %v2194_v17, %v2019_v22  ;;  %v1907_v39 = vld [vmem:[%s2543_s30 + $0xa8] sm:$0xf0] }
  0x98   : > { %v1910_v44 = vor.u32 %v2166_v38, %v1907_v39 }
  0xa6   : > { %858 = vmatmul.bf16.gmra.mxu0 %v1882_v34  ;;  %938 = vmatmul.bf16.gmra.mxu2 %v2010_v55 }
  0xa7   : > { %1027 = vmatmul.bf16.gmra.mxu1 %v1886_v35  ;;  %1107 = vmatmul.bf16.gmra.mxu3 %v2014_v57  ;;  %v1905_v35 = vld [vmem:[%s2543_s30 + $0xa0] sm:$0xf]  ;;  %v2196_v57 = vld [vmem:[%s2543_s30 + $0x194] sm:$0xf] }
  0xa8   : > { %v1906_v43 = vor.u32 %v2167_v37, %v1905_v35 }
  0xb3   : > { %v824_v48 = vpop.f32.mrf.mxu0 }
  0xb4   : > { %v993_v49 = vpop.f32.mrf.mxu1 }
  0xb5   : > { %v994_v50 = vadd.f32 %v993_v49, %v824_v48 }
  0xb6   : > { %863 = vmatmul.bf16.gmra.mxu0 %v1890_v46  ;;  %943 = vmatmul.bf16.gmra.mxu2 %v2018_v21 }
  0xb7   : > { %v1153_v54 = vpack.c.bf16 %v994_v50, %v994_v50  ;;  %1032 = vmatmul.bf16.gmra.mxu1 %v1894_v47  ;;  %v1418_v60 = vmul.f32 %v994_v50, %v994_v50  ;;  %v1283_v62 = vsel %vm1282_vm1, %v994_v50, 0.0  ;;  %1112 = vmatmul.bf16.gmra.mxu3 %v2022_v24 }
  0xb9   : > { %1218 = vst.msk [vmem:[%s2619_s12] sm:$0xf] %vm1217_vm0, %v1153_v54  ;;  %v1482_v7 = vsel %vm1282_vm1, %v1418_v60, 0.0  ;;  %v904_v30 = vpop.f32.mrf.mxu2  ;;  %v2027_v60 = vld [vmem:[%s2543_s30 + $0x198] sm:$0xf0] }
  0xba   : > { %v1073_v31 = vpop.f32.mrf.mxu3 }
  0xbb   : > { %v826_v58 = vpop.f32.mrf.mxu0  ;;  %v2653_v42 = vadd.f32 %v1073_v31, %v904_v30  ;;  %v2199_v30 = vld [vmem:[%s2543_s30 + $0x1a4] sm:$0xf0]  ;;  %v2198_v31 = vld [vmem:[%s2543_s30 + $0x1a4] sm:$0xf] }
  0xbc   : > { %v995_v59 = vpop.f32.mrf.mxu1 }
  0xbd   : > { %v996_v61 = vadd.f32 %v995_v59, %v826_v58  ;;  %v1185_v47 = vpack.c.bf16 %v2653_v42, %v2653_v42 }
  0xbf   : > { %v1154_v63 = vpack.c.bf16 %v996_v61, %v996_v61  ;;  %v1284_v0 = vsel %vm1282_vm1, %v996_v61, 0.0  ;;  %v1419_v1 = vmul.f32 %v996_v61, %v996_v61  ;;  %1250 = vst.msk [vmem:[%s2619_s12 + $0x80] sm:$0xf] %vm1217_vm0, %v1185_v47 }
  0xc0   : > { %v1285_v3 = vadd.f32 %v1284_v0, %v1283_v62  ;;  %v2026_v62 = vor.u32 %v2197_v56, %v2025_v52  ;;  %v2170_v52 = vld [vmem:[%s2543_s30 + $0xc4] sm:$0xf] }
  0xc1   : > { %1219 = vst.msk [vmem:[%s2619_s12 + $0x4] sm:$0xf] %vm1217_vm0, %v1154_v63  ;;  %v1483_v8 = vsel %vm1282_vm1, %v1419_v1, 0.0  ;;  %v906_v49 = vpop.f32.mrf.mxu2  ;;  %v2030_v63 = vor.u32 %v2196_v57, %v2027_v60 }
  0xc2   : > { %v1484_v9 = vadd.f32 %v1483_v8, %v1482_v7  ;;  %v1075_v50 = vpop.f32.mrf.mxu3 }
  0xc3   : > { %v829_v12 = vpop.f32.mrf.mxu0  ;;  %v2659_v51 = vadd.f32 %v1075_v50, %v906_v49  ;;  %v2171_v50 = vld [vmem:[%s2543_s30 + $0xc4] sm:$0xf0] }
  0xc4   : > { %v998_v13 = vpop.f32.mrf.mxu1 }
  0xc5   : > { %v999_v14 = vadd.f32 %v998_v13, %v829_v12  ;;  %v1186_v59 = vpack.c.bf16 %v2659_v51, %v2659_v51  ;;  %v2168_v12 = vld [vmem:[%s2543_s30 + $0xb4] sm:$0xf]  ;;  %v1915_v13 = vld [vmem:[%s2543_s30 + $0xb8] sm:$0xf0] }
  0xc6   : > { %868 = vmatmul.bf16.gmra.mxu0 %v1898_v10  ;;  %948 = vmatmul.bf16.gmra.mxu2 %v2026_v62 }
  0xc7   : > { %v1155_v18 = vpack.c.bf16 %v999_v14, %v999_v14  ;;  %v1286_v19 = vsel %vm1282_vm1, %v999_v14, 0.0  ;;  %v1420_v20 = vmul.f32 %v999_v14, %v999_v14  ;;  %1037 = vmatmul.bf16.gmra.mxu1 %v1902_v11  ;;  %1251 = vst.msk [vmem:[%s2619_s12 + $0x84] sm:$0xf] %vm1217_vm0, %v1186_v59  ;;  %1117 = vmatmul.bf16.gmra.mxu3 %v2030_v63  ;;  %v2169_v11 = vld [vmem:[%s2543_s30 + $0xb4] sm:$0xf0] }
  0xc8   : > { %v1287_v23 = vadd.f32 %v1286_v19, %v1285_v3 }
  0xc9   : > { %1220 = vst.msk [vmem:[%s2619_s12 + $0x8] sm:$0xf] %vm1217_vm0, %v1155_v18  ;;  %v1485_v25 = vsel %vm1282_vm1, %v1420_v20, 0.0  ;;  %v909_v4 = vpop.f32.mrf.mxu2  ;;  %v1918_v18 = vor.u32 %v2168_v12, %v1915_v13 }
  0xca   : > { %v1486_v26 = vadd.f32 %v1485_v25, %v1484_v9  ;;  %v1078_v5 = vpop.f32.mrf.mxu3  ;;  %v1913_v9 = vld [vmem:[%s2543_s30 + $0xb0] sm:$0xf] }
  0xcb   : > { %v831_v27 = vpop.f32.mrf.mxu0  ;;  %v2681_v16 = vadd.f32 %v1078_v5, %v909_v4  ;;  %v1914_v17 = vor.u32 %v2169_v11, %v1913_v9 }
  0xcc   : > { %v1000_v28 = vpop.f32.mrf.mxu1 }
  0xcd   : > { %v1001_v29 = vadd.f32 %v1000_v28, %v831_v27  ;;  %v1187_v21 = vpack.c.bf16 %v2681_v16, %v2681_v16 }
  0xcf   : > { %v1156_v32 = vpack.c.bf16 %v1001_v29, %v1001_v29  ;;  %v1288_v33 = vsel %vm1282_vm1, %v1001_v29, 0.0  ;;  %v1421_v34 = vmul.f32 %v1001_v29, %v1001_v29  ;;  %1252 = vst.msk [vmem:[%s2619_s12 + $0x88] sm:$0xf] %vm1217_vm0, %v1187_v21 }
  0xd0   : > { %v1289_v36 = vadd.f32 %v1288_v33, %v1287_v23 }
  0xd1   : > { %1221 = vst.msk [vmem:[%s2619_s12 + $0xc] sm:$0xf] %vm1217_vm0, %v1156_v32  ;;  %v1487_v40 = vsel %vm1282_vm1, %v1421_v34, 0.0  ;;  %v911_v23 = vpop.f32.mrf.mxu2  ;;  %v2035_v34 = vld [vmem:[%s2543_s30 + $0x1a8] sm:$0xf0] }
  0xd2   : > { %v1488_v41 = vadd.f32 %v1487_v40, %v1486_v26  ;;  %v1080_v24 = vpop.f32.mrf.mxu3  ;;  %v2033_v26 = vld [vmem:[%s2543_s30 + $0x1a0] sm:$0xf]  ;;  %v2038_v37 = vor.u32 %v2198_v31, %v2035_v34 }
  0xd3   : > { %v834_v45 = vpop.f32.mrf.mxu0  ;;  %v2687_v25 = vadd.f32 %v1080_v24, %v911_v23  ;;  %v1929_v24 = vld [vmem:[%s2543_s30 + $0xd0] sm:$0xf] }
  0xd4   : > { %v1003_v46 = vpop.f32.mrf.mxu1 }
  0xd5   : > { %v1004_v48 = vadd.f32 %v1003_v46, %v834_v45  ;;  %v1188_v33 = vpack.c.bf16 %v2687_v25, %v2687_v25 }
  0xd6   : > { %873 = vmatmul.bf16.gmra.mxu0 %v1906_v43 }
  0xd7   : > { %v1157_v53 = vpack.c.bf16 %v1004_v48, %v1004_v48  ;;  %v1290_v54 = vsel %vm1282_vm1, %v1004_v48, 0.0  ;;  %v1422_v55 = vmul.f32 %v1004_v48, %v1004_v48  ;;  %1042 = vmatmul.bf16.gmra.mxu1 %v1910_v44  ;;  %1253 = vst.msk [vmem:[%s2619_s12 + $0x8c] sm:$0xf] %vm1217_vm0, %v1188_v33  ;;  %1122 = vmatmul.bf16.gmra.mxu3 %v2038_v37  ;;  %v1921_v48 = vld [vmem:[%s2543_s30 + $0xc0] sm:$0xf] }
  0xd8   : > { %v1291_v58 = vadd.f32 %v1290_v54, %v1289_v36  ;;  %v2034_v36 = vor.u32 %v2199_v30, %v2033_v26  ;;  %v1922_v57 = vor.u32 %v2171_v50, %v1921_v48  ;;  %v2202_v48 = vld [vmem:[%s2543_s30 + $0x1c4] sm:$0xf] }
  0xd9   : > { %1222 = vst.msk [vmem:[%s2619_s12 + $0x10] sm:$0xf] %vm1217_vm0, %v1157_v53  ;;  %v1489_v61 = vsel %vm1282_vm1, %v1422_v55, 0.0  ;;  %v914_v43 = vpop.f32.mrf.mxu2  ;;  %v1923_v53 = vld [vmem:[%s2543_s30 + $0xc8] sm:$0xf0] }
  0xda   : > { %v1490_v0 = vadd.f32 %v1489_v61, %v1488_v41  ;;  %953 = vmatmul.bf16.gmra.mxu2 %v2034_v36  ;;  %v1083_v44 = vpop.f32.mrf.mxu3 }
  0xdb   : > { %v836_v1 = vpop.f32.mrf.mxu0  ;;  %v2709_v56 = vadd.f32 %v1083_v44, %v914_v43  ;;  %v2049_v43 = vld [vmem:[%s2543_s30 + $0x1c0] sm:$0xf] }
  0xdc   : > { %v1005_v2 = vpop.f32.mrf.mxu1 }
  0xdd   : > { %v1006_v3 = vadd.f32 %v1005_v2, %v836_v1  ;;  %v1189_v61 = vpack.c.bf16 %v2709_v56, %v2709_v56  ;;  %v2041_v2 = vld [vmem:[%s2543_s30 + $0x1b0] sm:$0xf] }
  0xdf   : > { %v1158_v6 = vpack.c.bf16 %v1006_v3, %v1006_v3  ;;  %v1292_v7 = vsel %vm1282_vm1, %v1006_v3, 0.0  ;;  %v1423_v8 = vmul.f32 %v1006_v3, %v1006_v3  ;;  %1254 = vst.msk [vmem:[%s2619_s12 + $0x90] sm:$0xf] %vm1217_vm0, %v1189_v61 }
  0xe0   : > { %v1293_v10 = vadd.f32 %v1292_v7, %v1291_v58  ;;  %v1926_v58 = vor.u32 %v2170_v52, %v1923_v53  ;;  %v2200_v7 = vld [vmem:[%s2543_s30 + $0x1b4] sm:$0xf]  ;;  %v2051_v52 = vld [vmem:[%s2543_s30 + $0x1c8] sm:$0xf0] }
  0xe1   : > { %1223 = vst.msk [vmem:[%s2619_s12 + $0x14] sm:$0xf] %vm1217_vm0, %v1158_v6  ;;  %v1491_v14 = vsel %vm1282_vm1, %v1423_v8, 0.0  ;;  %v916_v63 = vpop.f32.mrf.mxu2  ;;  %v2201_v6 = vld [vmem:[%s2543_s30 + $0x1b4] sm:$0xf0] }
  0xe2   : > { %v1492_v15 = vadd.f32 %v1491_v14, %v1490_v0  ;;  %v1085_v0 = vpop.f32.mrf.mxu3  ;;  %v2042_v12 = vor.u32 %v2201_v6, %v2041_v2  ;;  %v2174_v6 = vld [vmem:[%s2543_s30 + $0xe4] sm:$0xf] }
  0xe3   : > { %v839_v19 = vpop.f32.mrf.mxu0  ;;  %v2715_v1 = vadd.f32 %v1085_v0, %v916_v63 }
  0xe4   : > { %v1008_v20 = vpop.f32.mrf.mxu1 }
  0xe5   : > { %v1009_v22 = vadd.f32 %v1008_v20, %v839_v19  ;;  %v1190_v9 = vpack.c.bf16 %v2715_v1, %v2715_v1 }
  0xe6   : > { %878 = vmatmul.bf16.gmra.mxu0 %v1914_v17 }
  0xe7   : > { %v1159_v27 = vpack.c.bf16 %v1009_v22, %v1009_v22  ;;  %v1294_v28 = vsel %vm1282_vm1, %v1009_v22, 0.0  ;;  %v1424_v29 = vmul.f32 %v1009_v22, %v1009_v22  ;;  %1047 = vmatmul.bf16.gmra.mxu1 %v1918_v18  ;;  %1255 = vst.msk [vmem:[%s2619_s12 + $0x94] sm:$0xf] %vm1217_vm0, %v1190_v9 }
  0xe8   : > { %v1295_v32 = vadd.f32 %v1294_v28, %v1293_v10  ;;  %v2043_v10 = vld [vmem:[%s2543_s30 + $0x1b8] sm:$0xf0]  ;;  %v2172_v28 = vld [vmem:[%s2543_s30 + $0xd4] sm:$0xf] }
  0xe9   : > { %1224 = vst.msk [vmem:[%s2619_s12 + $0x18] sm:$0xf] %vm1217_vm0, %v1159_v27  ;;  %v1493_v35 = vsel %vm1282_vm1, %v1424_v29, 0.0  ;;  %v2046_v13 = vor.u32 %v2200_v7, %v2043_v10  ;;  %v919_v19 = vpop.f32.mrf.mxu2  ;;  %v2173_v27 = vld [vmem:[%s2543_s30 + $0xd4] sm:$0xf0] }
  0xea   : > { %v1494_v38 = vadd.f32 %v1493_v35, %v1492_v15  ;;  %958 = vmatmul.bf16.gmra.mxu2 %v2042_v12  ;;  %v1088_v20 = vpop.f32.mrf.mxu3  ;;  %v1931_v29 = vld [vmem:[%s2543_s30 + $0xd8] sm:$0xf0]  ;;  %v1930_v33 = vor.u32 %v2173_v27, %v1929_v24  ;;  %v1939_v7 = vld [vmem:[%s2543_s30 + $0xe8] sm:$0xf0]  ;;  %v2204_v27 = vld [vmem:[%s2543_s30 + $0x1d4] sm:$0xf] }
  0xeb   : > { %v841_v39 = vpop.f32.mrf.mxu0  ;;  %1127 = vmatmul.bf16.gmra.mxu3 %v2046_v13  ;;  %v1934_v34 = vor.u32 %v2172_v28, %v1931_v29  ;;  %v1942_v12 = vor.u32 %v2174_v6, %v1939_v7  ;;  %v2207_v6 = vld [vmem:[%s2543_s30 + $0x1e4] sm:$0xf0]  ;;  %v2206_v7 = vld [vmem:[%s2543_s30 + $0x1e4] sm:$0xf] }
  0xec   : > { %v1010_v40 = vpop.f32.mrf.mxu1 }
  0xed   : > { %v1011_v41 = vadd.f32 %v1010_v40, %v841_v39 }
  0xef   : > { %v1160_v45 = vpack.c.bf16 %v1011_v41, %v1011_v41  ;;  %v1296_v46 = vsel %vm1282_vm1, %v1011_v41, 0.0  ;;  %v1425_v47 = vmul.f32 %v1011_v41, %v1011_v41 }
  0xf0   : > { %v1297_v49 = vadd.f32 %v1296_v46, %v1295_v32  ;;  %v2737_v32 = vadd.f32 %v1088_v20, %v919_v19 }
  0xf1   : > { %1225 = vst.msk [vmem:[%s2619_s12 + $0x1c] sm:$0xf] %vm1217_vm0, %v1160_v45  ;;  %v1495_v54 = vsel %vm1282_vm1, %v1425_v47, 0.0  ;;  %v921_v39 = vpop.f32.mrf.mxu2  ;;  %v2203_v47 = vld [vmem:[%s2543_s30 + $0x1c4] sm:$0xf0] }
  0xf2   : > { %v1496_v55 = vadd.f32 %v1495_v54, %v1494_v38  ;;  %v1191_v37 = vpack.c.bf16 %v2737_v32, %v2737_v32  ;;  %v1090_v40 = vpop.f32.mrf.mxu3  ;;  %v2050_v54 = vor.u32 %v2203_v47, %v2049_v43 }
  0xf3   : > { %v844_v59 = vpop.f32.mrf.mxu0  ;;  %v2743_v41 = vadd.f32 %v1090_v40, %v921_v39 }
  0xf4   : > { %v1013_v60 = vpop.f32.mrf.mxu1  ;;  %1256 = vst.msk [vmem:[%s2619_s12 + $0x98] sm:$0xf] %vm1217_vm0, %v1191_v37 }
  0xf5   : > { %v1014_v62 = vadd.f32 %v1013_v60, %v844_v59  ;;  %v1192_v50 = vpack.c.bf16 %v2743_v41, %v2743_v41 }
  0xf6   : > { %883 = vmatmul.bf16.gmra.mxu0 %v1922_v57 }
  0xf7   : > { %v1161_v3 = vpack.c.bf16 %v1014_v62, %v1014_v62  ;;  %v1298_v4 = vsel %vm1282_vm1, %v1014_v62, 0.0  ;;  %v1426_v5 = vmul.f32 %v1014_v62, %v1014_v62  ;;  %1052 = vmatmul.bf16.gmra.mxu1 %v1926_v58  ;;  %1257 = vst.msk [vmem:[%s2619_s12 + $0x9c] sm:$0xf] %vm1217_vm0, %v1192_v50  ;;  %v1947_v50 = vld [vmem:[%s2543_s30 + $0xf8] sm:$0xf0] }
  0xf8   : > { %v1299_v8 = vadd.f32 %v1298_v4, %v1297_v49 }
  0xf9   : > { %1226 = vst.msk [vmem:[%s2619_s12 + $0x20] sm:$0xf] %vm1217_vm0, %v1161_v3  ;;  %v1497_v11 = vsel %vm1282_vm1, %v1426_v5, 0.0  ;;  %v924_v61 = vpop.f32.mrf.mxu2  ;;  %v1937_v3 = vld [vmem:[%s2543_s30 + $0xe0] sm:$0xf] }
  0xfa   : > { %v1498_v14 = vadd.f32 %v1497_v11, %v1496_v55  ;;  %v2054_v55 = vor.u32 %v2202_v48, %v2051_v52  ;;  %963 = vmatmul.bf16.gmra.mxu2 %v2050_v54  ;;  %v1093_v62 = vpop.f32.mrf.mxu3  ;;  %v2175_v5 = vld [vmem:[%s2543_s30 + $0xe4] sm:$0xf0]  ;;  %v2177_v48 = vld [vmem:[%s2543_s30 + $0xf4] sm:$0xf0] }
  0xfb   : > { %v846_v15 = vpop.f32.mrf.mxu0  ;;  %v2765_v10 = vadd.f32 %v1093_v62, %v924_v61  ;;  %v1938_v11 = vor.u32 %v2175_v5, %v1937_v3 }
  0xfc   : > { %v1015_v17 = vpop.f32.mrf.mxu1  ;;  %1132 = vmatmul.bf16.gmra.mxu3 %v2054_v55 }
  0xfd   : > { %v1016_v18 = vadd.f32 %v1015_v17, %v846_v15  ;;  %v1193_v15 = vpack.c.bf16 %v2765_v10, %v2765_v10 }
  0xff   : > { %v1162_v21 = vpack.c.bf16 %v1016_v18, %v1016_v18  ;;  %v1300_v22 = vsel %vm1282_vm1, %v1016_v18, 0.0  ;;  %v1427_v23 = vmul.f32 %v1016_v18, %v1016_v18  ;;  %1258 = vst.msk [vmem:[%s2619_s12 + $0xa0] sm:$0xf] %vm1217_vm0, %v1193_v15 }
 0x100   : > { %v1301_v26 = vadd.f32 %v1300_v22, %v1299_v8 }
 0x101   : > { %1227 = vst.msk [vmem:[%s2619_s12 + $0x24] sm:$0xf] %vm1217_vm0, %v1162_v21  ;;  %v1499_v30 = vsel %vm1282_vm1, %v1427_v23, 0.0  ;;  %v926_v18 = vpop.f32.mrf.mxu2  ;;  %v2057_v21 = vld [vmem:[%s2543_s30 + $0x1d0] sm:$0xf] }
 0x102   : > { %v1500_v31 = vadd.f32 %v1499_v30, %v1498_v14  ;;  %v1095_v19 = vpop.f32.mrf.mxu3  ;;  %v2059_v30 = vld [vmem:[%s2543_s30 + $0x1d8] sm:$0xf0] }
 0x103   : > { %v849_v35 = vpop.f32.mrf.mxu0  ;;  %v2771_v20 = vadd.f32 %v1095_v19, %v926_v18 }
 0x104   : > { %v1018_v36 = vpop.f32.mrf.mxu1 }
 0x105   : > { %v1019_v38 = vadd.f32 %v1018_v36, %v849_v35  ;;  %v1194_v29 = vpack.c.bf16 %v2771_v20, %v2771_v20 }
 0x106   : > { %888 = vmatmul.bf16.gmra.mxu0 %v1930_v33 }
 0x107   : > { %v1163_v44 = vpack.c.bf16 %v1019_v38, %v1019_v38  ;;  %v1302_v45 = vsel %vm1282_vm1, %v1019_v38, 0.0  ;;  %v1428_v46 = vmul.f32 %v1019_v38, %v1019_v38  ;;  %1057 = vmatmul.bf16.gmra.mxu1 %v1934_v34  ;;  %v2062_v34 = vor.u32 %v2204_v27, %v2059_v30  ;;  %1259 = vst.msk [vmem:[%s2619_s12 + $0xa4] sm:$0xf] %vm1217_vm0, %v1194_v29 }
 0x108   : > { %v1303_v49 = vadd.f32 %v1302_v45, %v1301_v26  ;;  %v2205_v26 = vld [vmem:[%s2543_s30 + $0x1d4] sm:$0xf0] }
 0x109   : > { %1228 = vst.msk [vmem:[%s2619_s12 + $0x28] sm:$0xf] %vm1217_vm0, %v1163_v44  ;;  %v1501_v53 = vsel %vm1282_vm1, %v1428_v46, 0.0  ;;  %v2058_v33 = vor.u32 %v2205_v26, %v2057_v21  ;;  %v929_v39 = vpop.f32.mrf.mxu2  ;;  %v1945_v46 = vld [vmem:[%s2543_s30 + $0xf0] sm:$0xf] }
 0x10a   : > { %v1502_v57 = vadd.f32 %v1501_v53, %v1500_v31  ;;  %v1098_v40 = vpop.f32.mrf.mxu3  ;;  %v1946_v55 = vor.u32 %v2177_v48, %v1945_v46  ;;  %v2208_v46 = vld [vmem:[%s2543_s30 + $0x1f4] sm:$0xf] }
 0x10b   : > { %v851_v58 = vpop.f32.mrf.mxu0  ;;  %968 = vmatmul.bf16.gmra.mxu2 %v2058_v33  ;;  %v2793_v54 = vadd.f32 %v1098_v40, %v929_v39  ;;  %v2073_v39 = vld [vmem:[%s2543_s30 + $0x1f0] sm:$0xf] }
 0x10c   : > { %v1020_v59 = vpop.f32.mrf.mxu1  ;;  %1137 = vmatmul.bf16.gmra.mxu3 %v2062_v34 }
 0x10d   : > { %v1021_v60 = vadd.f32 %v1020_v59, %v851_v58 }
 0x10f   : > { %v1164_v63 = vpack.c.bf16 %v1021_v60, %v1021_v60  ;;  %v1304_v0 = vsel %vm1282_vm1, %v1021_v60, 0.0  ;;  %v1429_v2 = vmul.f32 %v1021_v60, %v1021_v60  ;;  %v1195_v60 = vpack.c.bf16 %v2793_v54, %v2793_v54 }
 0x110   : > { %v1305_v4 = vadd.f32 %v1304_v0, %v1303_v49  ;;  %v2176_v49 = vld [vmem:[%s2543_s30 + $0xf4] sm:$0xf] }
 0x111   : > { %1229 = vst.msk [vmem:[%s2619_s12 + $0x2c] sm:$0xf] %vm1217_vm0, %v1164_v63  ;;  %v1503_v8 = vsel %vm1282_vm1, %v1429_v2, 0.0  ;;  %v931_v62 = vpop.f32.mrf.mxu2  ;;  %v2065_v2 = vld [vmem:[%s2543_s30 + $0x1e0] sm:$0xf] }
 0x112   : > { %v1504_v9 = vadd.f32 %v1503_v8, %v1502_v57  ;;  %v1950_v57 = vor.u32 %v2176_v49, %v1947_v50  ;;  %v1100_v63 = vpop.f32.mrf.mxu3  ;;  %1260 = vst.msk [vmem:[%s2619_s12 + $0xa8] sm:$0xf] %vm1217_vm0, %v1195_v60  ;;  %v2075_v49 = vld [vmem:[%s2543_s30 + $0x1f8] sm:$0xf0] }
 0x113   : > { %v854_v13 = vpop.f32.mrf.mxu0  ;;  %v2799_v0 = vadd.f32 %v1100_v63, %v931_v62 }
 0x114   : > { %v1023_v14 = vpop.f32.mrf.mxu1 }
 0x115   : > { %v1024_v17 = vadd.f32 %v1023_v14, %v854_v13  ;;  %v2066_v13 = vor.u32 %v2207_v6, %v2065_v2 }
 0x116   : > { %893 = vmatmul.bf16.gmra.mxu0 %v1938_v11  ;;  %v2067_v11 = vld [vmem:[%s2543_s30 + $0x1e8] sm:$0xf0] }
 0x117   : > { %v1165_v22 = vpack.c.bf16 %v1024_v17, %v1024_v17  ;;  %v1306_v23 = vsel %vm1282_vm1, %v1024_v17, 0.0  ;;  %v1430_v24 = vmul.f32 %v1024_v17, %v1024_v17  ;;  %1062 = vmatmul.bf16.gmra.mxu1 %v1942_v12  ;;  %v2070_v14 = vor.u32 %v2206_v7, %v2067_v11 }
 0x118   : > { %v1307_v28 = vadd.f32 %v1306_v23, %v1305_v4 }
 0x119   : > { %1230 = vst.msk [vmem:[%s2619_s12 + $0x30] sm:$0xf] %vm1217_vm0, %v1165_v22  ;;  %v1505_v31 = vsel %vm1282_vm1, %v1430_v24, 0.0  ;;  %v934_v21 = vpop.f32.mrf.mxu2 }
 0x11a   : > { %v1506_v35 = vadd.f32 %v1505_v31, %v1504_v9  ;;  %v1196_v9 = vpack.c.bf16 %v2799_v0, %v2799_v0  ;;  %v1103_v22 = vpop.f32.mrf.mxu3 }
 0x11b   : > { %v856_v36 = vpop.f32.mrf.mxu0  ;;  %973 = vmatmul.bf16.gmra.mxu2 %v2066_v13  ;;  %v2817_v30 = vadd.f32 %v1103_v22, %v934_v21 }
 0x11c   : > { %v1025_v37 = vpop.f32.mrf.mxu1  ;;  %1261 = vst.msk [vmem:[%s2619_s12 + $0xac] sm:$0xf] %vm1217_vm0, %v1196_v9  ;;  %1142 = vmatmul.bf16.gmra.mxu3 %v2070_v14 }
 0x11d   : > { %v1026_v38 = vadd.f32 %v1025_v37, %v856_v36  ;;  %v1197_v34 = vpack.c.bf16 %v2817_v30, %v2817_v30 }
 0x11f   : > { %v1166_v43 = vpack.c.bf16 %v1026_v38, %v1026_v38  ;;  %v1308_v44 = vsel %vm1282_vm1, %v1026_v38, 0.0  ;;  %v1431_v45 = vmul.f32 %v1026_v38, %v1026_v38  ;;  %1262 = vst.msk [vmem:[%s2619_s12 + $0xb0] sm:$0xf] %vm1217_vm0, %v1197_v34 }
 0x120   : > { %v1309_v47 = vadd.f32 %v1308_v44, %v1307_v28 }
 0x121   : > { %1231 = vst.msk [vmem:[%s2619_s12 + $0x34] sm:$0xf] %vm1217_vm0, %v1166_v43  ;;  %v1507_v52 = vsel %vm1282_vm1, %v1431_v45, 0.0  ;;  %v936_v36 = vpop.f32.mrf.mxu2  ;;  %v2209_v45 = vld [vmem:[%s2543_s30 + $0x1f4] sm:$0xf0]  ;;  %s266_s30 = scalar_lea.vmem [#allocation2], %s3207_s21 }
 0x122   : > { %v1508_v53 = vadd.f32 %v1507_v52, %v1506_v35  ;;  %v1105_v37 = vpop.f32.mrf.mxu3  ;;  %v2074_v52 = vor.u32 %v2209_v45, %v2073_v39  ;;  %s3218_s5 = sshll.u32 %s266_s30, 4  ;;  %s1645_s5 = int_to_ptr.vmem [resolvable:$true] %s3218_s5 }
 0x123   : > { %v859_v58 = vpop.f32.mrf.mxu0  ;;  %v2823_v38 = vadd.f32 %v1105_v37, %v936_v36 }
 0x124   : > { %v1028_v59 = vpop.f32.mrf.mxu1 }
 0x125   : > { %v1029_v61 = vadd.f32 %v1028_v59, %v859_v58  ;;  %v1198_v48 = vpack.c.bf16 %v2823_v38, %v2823_v38 }
 0x126   : > { %898 = vmatmul.bf16.gmra.mxu0 %v1946_v55 }
 0x127   : > { %v1167_v3 = vpack.c.bf16 %v1029_v61, %v1029_v61  ;;  %v1310_v4 = vsel %vm1282_vm1, %v1029_v61, 0.0  ;;  %v1432_v5 = vmul.f32 %v1029_v61, %v1029_v61  ;;  %1067 = vmatmul.bf16.gmra.mxu1 %v1950_v57  ;;  %1263 = vst.msk [vmem:[%s2619_s12 + $0xb4] sm:$0xf] %vm1217_vm0, %v1198_v48 }
 0x128   : > { %v1311_v8 = vadd.f32 %v1310_v4, %v1309_v47 }
 0x129   : > { %1232 = vst.msk [vmem:[%s2619_s12 + $0x38] sm:$0xf] %vm1217_vm0, %v1167_v3  ;;  %v1509_v12 = vsel %vm1282_vm1, %v1432_v5, 0.0  ;;  %v939_v60 = vpop.f32.mrf.mxu2 }
 0x12a   : > { %v1510_v15 = vadd.f32 %v1509_v12, %v1508_v53  ;;  %v2078_v53 = vor.u32 %v2208_v46, %v2075_v49  ;;  %v1108_v61 = vpop.f32.mrf.mxu3 }
 0x12b   : > { %v861_v17 = vpop.f32.mrf.mxu0  ;;  %978 = vmatmul.bf16.gmra.mxu2 %v2074_v52  ;;  %v2841_v6 = vadd.f32 %v1108_v61, %v939_v60 }
 0x12c   : > { %v1030_v18 = vpop.f32.mrf.mxu1  ;;  %1147 = vmatmul.bf16.gmra.mxu3 %v2078_v53 }
 0x12d   : > { %v1031_v19 = vadd.f32 %v1030_v18, %v861_v17  ;;  %v1199_v9 = vpack.c.bf16 %v2841_v6, %v2841_v6 }
 0x12f   : > { %v1168_v23 = vpack.c.bf16 %v1031_v19, %v1031_v19  ;;  %v1312_v24 = vsel %vm1282_vm1, %v1031_v19, 0.0  ;;  %v1433_v26 = vmul.f32 %v1031_v19, %v1031_v19  ;;  %1264 = vst.msk [vmem:[%s2619_s12 + $0xb8] sm:$0xf] %vm1217_vm0, %v1199_v9 }
 0x130   : > { %v1313_v27 = vadd.f32 %v1312_v24, %v1311_v8 }
 0x131   : > { %1233 = vst.msk [vmem:[%s2619_s12 + $0x3c] sm:$0xf] %vm1217_vm0, %v1168_v23  ;;  %v1511_v28 = vsel %vm1282_vm1, %v1433_v26, 0.0  ;;  %v941_v12 = vpop.f32.mrf.mxu2 }
 0x132   : > { %v1512_v29 = vadd.f32 %v1511_v28, %v1510_v15  ;;  %v1110_v13 = vpop.f32.mrf.mxu3 }
 0x133   : > { %v864_v31 = vpop.f32.mrf.mxu0  ;;  %v2847_v14 = vadd.f32 %v1110_v13, %v941_v12 }
 0x134   : > { %v1033_v33 = vpop.f32.mrf.mxu1 }
 0x135   : > { %v1034_v35 = vadd.f32 %v1033_v33, %v864_v31  ;;  %v1200_v21 = vpack.c.bf16 %v2847_v14, %v2847_v14 }
 0x137   : > { %v1169_v40 = vpack.c.bf16 %v1034_v35, %v1034_v35  ;;  %v1314_v43 = vsel %vm1282_vm1, %v1034_v35, 0.0  ;;  %v1434_v44 = vmul.f32 %v1034_v35, %v1034_v35  ;;  %1265 = vst.msk [vmem:[%s2619_s12 + $0xbc] sm:$0xf] %vm1217_vm0, %v1200_v21 }
 0x138   : > { %v1315_v47 = vadd.f32 %v1314_v43, %v1313_v27 }
 0x139   : > { %1234 = vst.msk [vmem:[%s2619_s12 + $0x40] sm:$0xf] %vm1217_vm0, %v1169_v40  ;;  %v1513_v50 = vsel %vm1282_vm1, %v1434_v44, 0.0  ;;  %v944_v28 = vpop.f32.mrf.mxu2 }
 0x13a   : > { %v1514_v55 = vadd.f32 %v1513_v50, %v1512_v29  ;;  %v1113_v29 = vpop.f32.mrf.mxu3 }
 0x13b   : > { %v866_v57 = vpop.f32.mrf.mxu0  ;;  %v2861_v39 = vadd.f32 %v1113_v29, %v944_v28 }
 0x13c   : > { %v1035_v58 = vpop.f32.mrf.mxu1 }
 0x13d   : > { %v1036_v59 = vadd.f32 %v1035_v58, %v866_v57  ;;  %v1201_v44 = vpack.c.bf16 %v2861_v39, %v2861_v39 }
 0x13f   : > { %v1170_v62 = vpack.c.bf16 %v1036_v59, %v1036_v59  ;;  %v1316_v63 = vsel %vm1282_vm1, %v1036_v59, 0.0  ;;  %v1435_v2 = vmul.f32 %v1036_v59, %v1036_v59  ;;  %1266 = vst.msk [vmem:[%s2619_s12 + $0xc0] sm:$0xf] %vm1217_vm0, %v1201_v44 }
 0x140   : > { %v1317_v3 = vadd.f32 %v1316_v63, %v1315_v47 }
 0x141   : > { %1235 = vst.msk [vmem:[%s2619_s12 + $0x44] sm:$0xf] %vm1217_vm0, %v1170_v62  ;;  %v1515_v4 = vsel %vm1282_vm1, %v1435_v2, 0.0  ;;  %v946_v46 = vpop.f32.mrf.mxu2 }
 0x142   : > { %v1516_v5 = vadd.f32 %v1515_v4, %v1514_v55  ;;  %v1115_v47 = vpop.f32.mrf.mxu3 }
 0x143   : > { %v869_v7 = vpop.f32.mrf.mxu0  ;;  %v2867_v48 = vadd.f32 %v1115_v47, %v946_v46 }
 0x144   : > { %v1038_v8 = vpop.f32.mrf.mxu1 }
 0x145   : > { %v1039_v11 = vadd.f32 %v1038_v8, %v869_v7  ;;  %v1202_v55 = vpack.c.bf16 %v2867_v48, %v2867_v48 }
 0x147   : > { %v1171_v15 = vpack.c.bf16 %v1039_v11, %v1039_v11  ;;  %v1318_v17 = vsel %vm1282_vm1, %v1039_v11, 0.0  ;;  %v1436_v18 = vmul.f32 %v1039_v11, %v1039_v11  ;;  %1267 = vst.msk [vmem:[%s2619_s12 + $0xc4] sm:$0xf] %vm1217_vm0, %v1202_v55 }
 0x148   : > { %v1319_v19 = vadd.f32 %v1318_v17, %v1317_v3 }
 0x149   : > { %1236 = vst.msk [vmem:[%s2619_s12 + $0x48] sm:$0xf] %vm1217_vm0, %v1171_v15  ;;  %v1517_v22 = vsel %vm1282_vm1, %v1436_v18, 0.0  ;;  %v949_v62 = vpop.f32.mrf.mxu2 }
 0x14a   : > { %v1518_v23 = vadd.f32 %v1517_v22, %v1516_v5  ;;  %v1118_v63 = vpop.f32.mrf.mxu3 }
 0x14b   : > { %v871_v24 = vpop.f32.mrf.mxu0  ;;  %v2887_v3 = vadd.f32 %v1118_v63, %v949_v62 }
 0x14c   : > { %v1040_v26 = vpop.f32.mrf.mxu1 }
 0x14d   : > { %v1041_v27 = vadd.f32 %v1040_v26, %v871_v24  ;;  %v1203_v7 = vpack.c.bf16 %v2887_v3, %v2887_v3 }
 0x14f   : > { %v1172_v31 = vpack.c.bf16 %v1041_v27, %v1041_v27  ;;  %v1320_v33 = vsel %vm1282_vm1, %v1041_v27, 0.0  ;;  %v1437_v34 = vmul.f32 %v1041_v27, %v1041_v27  ;;  %1268 = vst.msk [vmem:[%s2619_s12 + $0xc8] sm:$0xf] %vm1217_vm0, %v1203_v7 }
 0x150   : > { %v1321_v35 = vadd.f32 %v1320_v33, %v1319_v19 }
 0x151   : > { %1237 = vst.msk [vmem:[%s2619_s12 + $0x4c] sm:$0xf] %vm1217_vm0, %v1172_v31  ;;  %v1519_v36 = vsel %vm1282_vm1, %v1437_v34, 0.0  ;;  %v951_v9 = vpop.f32.mrf.mxu2 }
 0x152   : > { %v1520_v37 = vadd.f32 %v1519_v36, %v1518_v23  ;;  %v1120_v11 = vpop.f32.mrf.mxu3 }
 0x153   : > { %v874_v40 = vpop.f32.mrf.mxu0  ;;  %v2897_v13 = vadd.f32 %v1120_v11, %v951_v9 }
 0x154   : > { %v1043_v43 = vpop.f32.mrf.mxu1 }
 0x155   : > { %v1044_v45 = vadd.f32 %v1043_v43, %v874_v40  ;;  %v1204_v15 = vpack.c.bf16 %v2897_v13, %v2897_v13 }
 0x157   : > { %v1173_v49 = vpack.c.bf16 %v1044_v45, %v1044_v45  ;;  %v1322_v50 = vsel %vm1282_vm1, %v1044_v45, 0.0  ;;  %v1438_v52 = vmul.f32 %v1044_v45, %v1044_v45  ;;  %1269 = vst.msk [vmem:[%s2619_s12 + $0xcc] sm:$0xf] %vm1217_vm0, %v1204_v15 }
 0x158   : > { %v2870_v53 = vadd.f32 %v1322_v50, %v1321_v35 }
 0x159   : > { %1238 = vst.msk [vmem:[%s2619_s12 + $0x50] sm:$0xf] %vm1217_vm0, %v1173_v49  ;;  %v1521_v57 = vsel %vm1282_vm1, %v1438_v52, 0.0 }
 0x15a   : > { %v2877_v58 = vadd.f32 %v1521_v57, %v1520_v37  ;;  %v1123_v22 = vpop.f32.mrf.mxu3 }
 0x15b   : > { %v876_v59 = vpop.f32.mrf.mxu0 }
 0x15c   : > { %v1045_v60 = vpop.f32.mrf.mxu1 }
 0x15d   : > { %v2881_v61 = vadd.f32 %v1045_v60, %v876_v59  ;;  %v954_v21 = vpop.f32.mrf.mxu2 }
 0x15e   : > { %v2911_v24 = vadd.f32 %v1123_v22, %v954_v21 }
 0x15f   : > { %v1174_v2 = vpack.c.bf16 %v2881_v61, %v2881_v61 }
 0x160   : > { %v1205_v28 = vpack.c.bf16 %v2911_v24, %v2911_v24 }
 0x161   : > { %1239 = vst.msk [vmem:[%s2619_s12 + $0x54] sm:$0xf] %vm1217_vm0, %v1174_v2 }
 0x162   : > { %1270 = vst.msk [vmem:[%s2619_s12 + $0xd0] sm:$0xf] %vm1217_vm0, %v1205_v28  ;;  %v1125_v33 = vpop.f32.mrf.mxu3 }
 0x163   : > { %v879_v4 = vpop.f32.mrf.mxu0 }
 0x164   : > { %v1048_v5 = vpop.f32.mrf.mxu1 }
 0x165   : > { %v2891_v8 = vadd.f32 %v1048_v5, %v879_v4  ;;  %v956_v31 = vpop.f32.mrf.mxu2 }
 0x166   : > { %v2921_v35 = vadd.f32 %v1125_v33, %v956_v31  ;;  %v1324_v31 = vsel %vm1282_vm1, %v2881_v61, 0.0 }
 0x167   : > { %v1175_v12 = vpack.c.bf16 %v2891_v8, %v2891_v8  ;;  %v1440_v33 = vmul.f32 %v2891_v8, %v2891_v8 }
 0x168   : > { %v1206_v36 = vpack.c.bf16 %v2921_v35, %v2921_v35 }
 0x169   : > { %1240 = vst.msk [vmem:[%s2619_s12 + $0x58] sm:$0xf] %vm1217_vm0, %v1175_v12 }
 0x16a   : > { %1271 = vst.msk [vmem:[%s2619_s12 + $0xd4] sm:$0xf] %vm1217_vm0, %v1206_v36 }
 0x16b   : > { %v881_v17 = vpop.f32.mrf.mxu0 }
 0x16c   : > { %v1050_v18 = vpop.f32.mrf.mxu1 }
 0x16d   : > { %v2905_v19 = vadd.f32 %v1050_v18, %v881_v17  ;;  %v959_v44 = vpop.f32.mrf.mxu2 }
 0x16e   : > { %v1128_v45 = vpop.f32.mrf.mxu3 }
 0x16f   : > { %v1176_v23 = vpack.c.bf16 %v2905_v19, %v2905_v19  ;;  %v2935_v47 = vadd.f32 %v1128_v45, %v959_v44 }
 0x171   : > { %1241 = vst.msk [vmem:[%s2619_s12 + $0x5c] sm:$0xf] %vm1217_vm0, %v1176_v23  ;;  %v1207_v52 = vpack.c.bf16 %v2935_v47, %v2935_v47  ;;  %v1439_v23 = vmul.f32 %v2881_v61, %v2881_v61  ;;  %v1325_v61 = vadd.f32 %v1324_v31, %v2870_v53 }
 0x173   : > { %v884_v26 = vpop.f32.mrf.mxu0  ;;  %1272 = vst.msk [vmem:[%s2619_s12 + $0xd8] sm:$0xf] %vm1217_vm0, %v1207_v52  ;;  %v1523_v36 = vsel %vm1282_vm1, %v1439_v23, 0.0 }
 0x174   : > { %v1053_v27 = vpop.f32.mrf.mxu1 }
 0x175   : > { %v2915_v29 = vadd.f32 %v1053_v27, %v884_v26  ;;  %v961_v57 = vpop.f32.mrf.mxu2 }
 0x176   : > { %v1130_v59 = vpop.f32.mrf.mxu3 }
 0x177   : > { %v1177_v34 = vpack.c.bf16 %v2915_v29, %v2915_v29  ;;  %v2941_v62 = vadd.f32 %v1130_v59, %v961_v57 }
 0x179   : > { %1242 = vst.msk [vmem:[%s2619_s12 + $0x60] sm:$0xf] %vm1217_vm0, %v1177_v34  ;;  %v1208_v63 = vpack.c.bf16 %v2941_v62, %v2941_v62 }
 0x17b   : > { %v886_v37 = vpop.f32.mrf.mxu0  ;;  %1273 = vst.msk [vmem:[%s2619_s12 + $0xdc] sm:$0xf] %vm1217_vm0, %v1208_v63  ;;  %v1330_v63 = vsel %vm1282_vm1, %v2915_v29, 0.0 }
 0x17c   : > { %v1055_v40 = vpop.f32.mrf.mxu1 }
 0x17d   : > { %v2929_v43 = vadd.f32 %v1055_v40, %v886_v37  ;;  %v964_v7 = vpop.f32.mrf.mxu2  ;;  %v1326_v37 = vsel %vm1282_vm1, %v2891_v8, 0.0  ;;  %v1441_v40 = vmul.f32 %v2905_v19, %v2905_v19  ;;  %v1524_v8 = vadd.f32 %v1523_v36, %v2877_v58 }
 0x17e   : > { %v1327_v57 = vadd.f32 %v1326_v37, %v1325_v61 }
 0x17f   : > { %v1178_v46 = vpack.c.bf16 %v2929_v43, %v2929_v43  ;;  %v1133_v9 = vpop.f32.mrf.mxu3  ;;  %v1527_v53 = vsel %vm1282_vm1, %v1441_v40, 0.0  ;;  %v1332_v58 = vsel %vm1282_vm1, %v2929_v43, 0.0 }
 0x180   : > { %v2951_v18 = vadd.f32 %v1133_v9, %v964_v7 }
 0x181   : > { %1243 = vst.msk [vmem:[%s2619_s12 + $0x64] sm:$0xf] %vm1217_vm0, %v1178_v46  ;;  %v1525_v46 = vsel %vm1282_vm1, %v1440_v33, 0.0 }
 0x182   : > { %v1209_v27 = vpack.c.bf16 %v2951_v18, %v2951_v18 }
 0x183   : > { %v889_v49 = vpop.f32.mrf.mxu0 }
 0x184   : > { %v1058_v50 = vpop.f32.mrf.mxu1  ;;  %1274 = vst.msk [vmem:[%s2619_s12 + $0xe0] sm:$0xf] %vm1217_vm0, %v1209_v27 }
 0x185   : > { %v1059_v55 = vadd.f32 %v1058_v50, %v889_v49  ;;  %v966_v21 = vpop.f32.mrf.mxu2  ;;  %v1328_v49 = vsel %vm1282_vm1, %v2905_v19, 0.0  ;;  %v1442_v50 = vmul.f32 %v2915_v29, %v2915_v29  ;;  %v1526_v19 = vadd.f32 %v1525_v46, %v1524_v8 }
 0x186   : > { %v1329_v7 = vadd.f32 %v1328_v49, %v1327_v57 }
 0x187   : > { %v1179_v60 = vpack.c.bf16 %v1059_v55, %v1059_v55  ;;  %v1135_v22 = vpop.f32.mrf.mxu3  ;;  %v1444_v9 = vmul.f32 %v1059_v55, %v1059_v55  ;;  %v1334_v29 = vsel %vm1282_vm1, %v1059_v55, 0.0 }
 0x188   : > { %v2957_v28 = vadd.f32 %v1135_v22, %v966_v21 }
 0x189   : > { %1244 = vst.msk [vmem:[%s2619_s12 + $0x68] sm:$0xf] %vm1217_vm0, %v1179_v60  ;;  %v1533_v27 = vsel %vm1282_vm1, %v1444_v9, 0.0 }
 0x18a   : > { %v1210_v34 = vpack.c.bf16 %v2957_v28, %v2957_v28 }
 0x18b   : > { %v891_v2 = vpop.f32.mrf.mxu0 }
 0x18c   : > { %v1060_v4 = vpop.f32.mrf.mxu1  ;;  %1275 = vst.msk [vmem:[%s2619_s12 + $0xe4] sm:$0xf] %vm1217_vm0, %v1210_v34 }
 0x18d   : > { %v1061_v5 = vadd.f32 %v1060_v4, %v891_v2  ;;  %v1443_v2 = vmul.f32 %v2929_v43, %v2929_v43 }
 0x18e   : > { %v969_v59 = vpop.f32.mrf.mxu2 }
 0x18f   : > { %v1180_v11 = vpack.c.bf16 %v1061_v5, %v1061_v5  ;;  %v1138_v60 = vpop.f32.mrf.mxu3  ;;  %v1445_v21 = vmul.f32 %v1061_v5, %v1061_v5  ;;  %v1531_v22 = vsel %vm1282_vm1, %v1443_v2, 0.0  ;;  %v1336_v34 = vsel %vm1282_vm1, %v1061_v5, 0.0 }
 0x190   : > { %v2997_v43 = vadd.f32 %v1138_v60, %v969_v59 }
 0x191   : > { %1245 = vst.msk [vmem:[%s2619_s12 + $0x6c] sm:$0xf] %vm1217_vm0, %v1180_v11  ;;  %v1529_v11 = vsel %vm1282_vm1, %v1442_v50, 0.0 }
 0x192   : > { %v1211_v8 = vpack.c.bf16 %v2997_v43, %v2997_v43 }
 0x193   : > { %v894_v12 = vpop.f32.mrf.mxu0 }
 0x194   : > { %v1063_v15 = vpop.f32.mrf.mxu1  ;;  %1276 = vst.msk [vmem:[%s2619_s12 + $0xe8] sm:$0xf] %vm1217_vm0, %v1211_v8 }
 0x195   : > { %v1064_v17 = vadd.f32 %v1063_v15, %v894_v12  ;;  %v1528_v12 = vadd.f32 %v1527_v53, %v1526_v19  ;;  %v1331_v15 = vadd.f32 %v1330_v63, %v1329_v7 }
 0x197   : > { %v1181_v26 = vpack.c.bf16 %v1064_v17, %v1064_v17  ;;  %v1530_v23 = vadd.f32 %v1529_v11, %v1528_v12  ;;  %v1446_v36 = vmul.f32 %v1064_v17, %v1064_v17  ;;  %v1140_v55 = vpop.f32.mrf.mxu3  ;;  %v1338_v46 = vsel %vm1282_vm1, %v1064_v17, 0.0 }
 0x199   : > { %1246 = vst.msk [vmem:[%s2619_s12 + $0x70] sm:$0xf] %vm1217_vm0, %v1181_v26  ;;  %v1333_v26 = vadd.f32 %v1332_v58, %v1331_v15  ;;  %v1532_v40 = vadd.f32 %v1531_v22, %v1530_v23  ;;  %v1537_v59 = vsel %vm1282_vm1, %v1446_v36, 0.0 }
 0x19b   : > { %v896_v44 = vpop.f32.mrf.mxu0  ;;  %v1335_v61 = vadd.f32 %v1334_v29, %v1333_v26  ;;  %v1534_v5 = vadd.f32 %v1533_v27, %v1532_v40  ;;  %v1450_v26 = vmul.f32 %v2653_v42, %v2653_v42  ;;  %v1451_v40 = vmul.f32 %v2659_v51, %v2659_v51 }
 0x19c   : > { %v1065_v45 = vpop.f32.mrf.mxu1 }
 0x19d   : > { %v1066_v52 = vadd.f32 %v1065_v45, %v896_v44  ;;  %v1535_v44 = vsel %vm1282_vm1, %v1445_v21, 0.0  ;;  %v971_v45 = vpop.f32.mrf.mxu2  ;;  %v1337_v57 = vadd.f32 %v1336_v34, %v1335_v61 }
 0x19e   : > { %v3003_v53 = vadd.f32 %v1140_v55, %v971_v45  ;;  %v1536_v2 = vadd.f32 %v1535_v44, %v1534_v5  ;;  %v1452_v44 = vmul.f32 %v2681_v16, %v2681_v16  ;;  %v1350_v5 = vsel %vm1282_vm1, %v2681_v16, 0.0 }
 0x19f   : > { %v1182_v4 = vpack.c.bf16 %v1066_v52, %v1066_v52  ;;  %v1447_v49 = vmul.f32 %v1066_v52, %v1066_v52  ;;  %v1340_v60 = vsel %vm1282_vm1, %v1066_v52, 0.0  ;;  %v1143_v23 = vpop.f32.mrf.mxu3 }
 0x1a0   : > { %v1212_v17 = vpack.c.bf16 %v3003_v53, %v3003_v53  ;;  %v1538_v9 = vadd.f32 %v1537_v59, %v1536_v2 }
 0x1a1   : > { %1247 = vst.msk [vmem:[%s2619_s12 + $0x74] sm:$0xf] %vm1217_vm0, %v1182_v4  ;;  %v1339_v4 = vadd.f32 %v1338_v46, %v1337_v57  ;;  %v1539_v19 = vsel %vm1282_vm1, %v1447_v49, 0.0  ;;  %v1545_v46 = vsel %vm1282_vm1, %v1450_v26, 0.0  ;;  %v1348_v49 = vsel %vm1282_vm1, %v2659_v51, 0.0 }
 0x1a2   : > { %1277 = vst.msk [vmem:[%s2619_s12 + $0xec] sm:$0xf] %vm1217_vm0, %v1212_v17  ;;  %v1540_v21 = vadd.f32 %v1539_v19, %v1538_v9  ;;  %v1453_v57 = vmul.f32 %v2687_v25, %v2687_v25  ;;  %v1352_v51 = vsel %vm1282_vm1, %v2687_v25, 0.0  ;;  %v1454_v19 = vmul.f32 %v2709_v56, %v2709_v56 }
 0x1a3   : > { %v899_v31 = vpop.f32.mrf.mxu0  ;;  %v1341_v11 = vadd.f32 %v1340_v60, %v1339_v4  ;;  %v1549_v60 = vsel %vm1282_vm1, %v1452_v44, 0.0  ;;  %v1458_v44 = vmul.f32 %v2765_v10, %v2765_v10 }
 0x1a4   : > { %v1068_v33 = vpop.f32.mrf.mxu1 }
 0x1a5   : > { %v1069_v37 = vadd.f32 %v1068_v33, %v899_v31  ;;  %v974_v29 = vpop.f32.mrf.mxu2 }
 0x1a6   : > { %v3038_v59 = vadd.f32 %v1143_v23, %v974_v29  ;;  %v1356_v29 = vsel %vm1282_vm1, %v2715_v1, 0.0  ;;  %v1456_v23 = vmul.f32 %v2737_v32, %v2737_v32 }
 0x1a7   : > { %v1183_v50 = vpack.c.bf16 %v1069_v37, %v1069_v37  ;;  %v1448_v63 = vmul.f32 %v1069_v37, %v1069_v37  ;;  %v1342_v7 = vsel %vm1282_vm1, %v1069_v37, 0.0  ;;  %v1346_v37 = vsel %vm1282_vm1, %v2653_v42, 0.0  ;;  %v1145_v17 = vpop.f32.mrf.mxu3 }
 0x1a8   : > { %v1343_v22 = vadd.f32 %v1342_v7, %v1341_v11  ;;  %v1547_v42 = vsel %vm1282_vm1, %v1451_v40, 0.0  ;;  %v1213_v16 = vpack.c.bf16 %v3038_v59, %v3038_v59 }
 0x1a9   : > { %1248 = vst.msk [vmem:[%s2619_s12 + $0x78] sm:$0xf] %vm1217_vm0, %v1183_v50  ;;  %v1541_v52 = vsel %vm1282_vm1, %v1448_v63, 0.0 }
 0x1aa   : > { %v1542_v34 = vadd.f32 %v1541_v52, %v1540_v21  ;;  %v1455_v52 = vmul.f32 %v2715_v1, %v2715_v1  ;;  %1278 = vst.msk [vmem:[%s2619_s12 + $0xf0] sm:$0xf] %vm1217_vm0, %v1213_v16  ;;  %v1557_v1 = vsel %vm1282_vm1, %v1456_v23, 0.0 }
 0x1ab   : > { %v901_v58 = vpop.f32.mrf.mxu0 }
 0x1ac   : > { %v1070_v12 = vpop.f32.mrf.mxu1 }
 0x1ad   : > { %v1071_v15 = vadd.f32 %v1070_v12, %v901_v58  ;;  %v976_v4 = vpop.f32.mrf.mxu2  ;;  %v1551_v58 = vsel %vm1282_vm1, %v1453_v57, 0.0  ;;  %v1354_v12 = vsel %vm1282_vm1, %v2709_v56, 0.0 }
 0x1ae   : > { %v3047_v7 = vadd.f32 %v1145_v17, %v976_v4 }
 0x1af   : > { %v1184_v27 = vpack.c.bf16 %v1071_v15, %v1071_v15  ;;  %v1344_v31 = vsel %vm1282_vm1, %v1071_v15, 0.0  ;;  %v1449_v33 = vmul.f32 %v1071_v15, %v1071_v15  ;;  %v1148_v40 = vpop.f32.mrf.mxu3 }
 0x1b0   : > { %v1345_v36 = vadd.f32 %v1344_v31, %v1343_v22  ;;  %v1214_v25 = vpack.c.bf16 %v3047_v7, %v3047_v7  ;;  %v1553_v22 = vsel %vm1282_vm1, %v1454_v19, 0.0  ;;  %v1358_v31 = vsel %vm1282_vm1, %v2737_v32, 0.0 }
 0x1b1   : > { %1249 = vst.msk [vmem:[%s2619_s12 + $0x7c] sm:$0xf] %vm1217_vm0, %v1184_v27  ;;  %v1543_v61 = vsel %vm1282_vm1, %v1449_v33, 0.0  ;;  %v1555_v27 = vsel %vm1282_vm1, %v1455_v52, 0.0  ;;  %v1457_v33 = vmul.f32 %v2743_v41, %v2743_v41  ;;  %v1362_v32 = vsel %vm1282_vm1, %v2765_v10, 0.0 }
 0x1b2   : > { %v1347_v45 = vadd.f32 %v1346_v37, %v1345_v36  ;;  %v1544_v55 = vadd.f32 %v1543_v61, %v1542_v34  ;;  %1279 = vst.msk [vmem:[%s2619_s12 + $0xf4] sm:$0xf] %vm1217_vm0, %v1214_v25  ;;  %v1360_v61 = vsel %vm1282_vm1, %v2743_v41, 0.0  ;;  %v1561_v41 = vsel %vm1282_vm1, %v1458_v44, 0.0 }
 0x1b3   : > { %v1366_v10 = vsel %vm1282_vm1, %v2793_v54, 0.0 }
 0x1b4   : > { %v1349_v50 = vadd.f32 %v1348_v49, %v1347_v45  ;;  %v1546_v8 = vadd.f32 %v1545_v46, %v1544_v55  ;;  %v1559_v46 = vsel %vm1282_vm1, %v1457_v33, 0.0  ;;  %v1459_v49 = vmul.f32 %v2771_v20, %v2771_v20 }
 0x1b5   : > { %v979_v37 = vpop.f32.mrf.mxu2  ;;  %v1374_v33 = vsel %vm1282_vm1, %v2841_v6, 0.0 }
 0x1b6   : > { %v1351_v63 = vadd.f32 %v1350_v5, %v1349_v50  ;;  %v1548_v2 = vadd.f32 %v1547_v42, %v1546_v8  ;;  %v1460_v50 = vmul.f32 %v2793_v54, %v2793_v54  ;;  %v1364_v5 = vsel %vm1282_vm1, %v2771_v20, 0.0 }
 0x1b7   : > { %v3090_v4 = vadd.f32 %v1148_v40, %v979_v37  ;;  %v1368_v20 = vsel %vm1282_vm1, %v2799_v0, 0.0 }
 0x1b8   : > { %v1353_v9 = vadd.f32 %v1352_v51, %v1351_v63  ;;  %v1550_v11 = vadd.f32 %v1549_v60, %v1548_v2  ;;  %v1563_v63 = vsel %vm1282_vm1, %v1459_v49, 0.0  ;;  %v1461_v2 = vmul.f32 %v2799_v0, %v2799_v0 }
 0x1b9   : > { %v1565_v17 = vsel %vm1282_vm1, %v1460_v50, 0.0  ;;  %v1215_v54 = vpack.c.bf16 %v3090_v4, %v3090_v4  ;;  %v1468_v50 = vmul.f32 %v2887_v3, %v2887_v3 }
 0x1ba   : > { %v1355_v15 = vadd.f32 %v1354_v12, %v1353_v9  ;;  %v1552_v21 = vadd.f32 %v1551_v58, %v1550_v11  ;;  %v1150_v9 = vpop.f32.mrf.mxu3  ;;  %v1462_v11 = vmul.f32 %v2817_v30, %v2817_v30  ;;  %v1567_v25 = vsel %vm1282_vm1, %v1461_v2, 0.0 }
 0x1bb   : > { %1280 = vst.msk [vmem:[%s2619_s12 + $0xf8] sm:$0xf] %vm1217_vm0, %v1215_v54 }
 0x1bc   : > { %v1357_v56 = vadd.f32 %v1356_v29, %v1355_v15  ;;  %v1554_v26 = vadd.f32 %v1553_v22, %v1552_v21  ;;  %v1370_v15 = vsel %vm1282_vm1, %v2817_v30, 0.0  ;;  %v1463_v21 = vmul.f32 %v2823_v38, %v2823_v38 }
 0x1bd   : > { %v981_v16 = vpop.f32.mrf.mxu2  ;;  %v1569_v23 = vsel %vm1282_vm1, %v1462_v11, 0.0  ;;  %v1472_v11 = vmul.f32 %v2935_v47, %v2935_v47 }
 0x1be   : > { %v1359_v34 = vadd.f32 %v1358_v31, %v1357_v56  ;;  %v1556_v36 = vadd.f32 %v1555_v27, %v1554_v26  ;;  %v3099_v58 = vadd.f32 %v1150_v9, %v981_v16  ;;  %v1372_v56 = vsel %vm1282_vm1, %v2823_v38, 0.0 }
 0x1bf   : > { %v1464_v26 = vmul.f32 %v2841_v6, %v2841_v6  ;;  %v1571_v31 = vsel %vm1282_vm1, %v1463_v21, 0.0  ;;  %v1376_v38 = vsel %vm1282_vm1, %v2847_v14, 0.0  ;;  %v1378_v6 = vsel %vm1282_vm1, %v2861_v39, 0.0 }
 0x1c0   : > { %v1361_v45 = vadd.f32 %v1360_v61, %v1359_v34  ;;  %v1558_v55 = vadd.f32 %v1557_v1, %v1556_v36  ;;  %v1216_v0 = vpack.c.bf16 %v3099_v58, %v3099_v58  ;;  %v1465_v34 = vmul.f32 %v2847_v14, %v2847_v14 }
 0x1c1   : > { %v1573_v40 = vsel %vm1282_vm1, %v1464_v26, 0.0  ;;  %v1466_v1 = vmul.f32 %v2861_v39, %v2861_v39  ;;  %v1380_v14 = vsel %vm1282_vm1, %v2867_v48, 0.0  ;;  %v1382_v39 = vsel %vm1282_vm1, %v2887_v3, 0.0 }
 0x1c2   : > { %v1363_v8 = vadd.f32 %v1362_v32, %v1361_v45  ;;  %v1560_v42 = vadd.f32 %v1559_v46, %v1558_v55  ;;  %1281 = vst.msk [vmem:[%s2619_s12 + $0xfc] sm:$0xf] %vm1217_vm0, %v1216_v0  ;;  %v1575_v45 = vsel %vm1282_vm1, %v1465_v34, 0.0  ;;  %v1467_v55 = vmul.f32 %v2867_v48, %v2867_v48 }
 0x1c3   : > { %v1577_v49 = vsel %vm1282_vm1, %v1466_v1, 0.0  ;;  %v1384_v48 = vsel %vm1282_vm1, %v2897_v13, 0.0  ;;  %v1386_v3 = vsel %vm1282_vm1, %v2911_v24, 0.0  ;;  %v1589_v0 = vsel %vm1282_vm1, %v1472_v11, 0.0 }
 0x1c4   : > { %v1365_v57 = vadd.f32 %v1364_v5, %v1363_v8  ;;  %v1562_v60 = vadd.f32 %v1561_v41, %v1560_v42  ;;  %v1579_v41 = vsel %vm1282_vm1, %v1467_v55, 0.0  ;;  %v1469_v5 = vmul.f32 %v2897_v13, %v2897_v13 }
 0x1c5   : > { %v1388_v13 = vsel %vm1282_vm1, %v2921_v35, 0.0  ;;  %v1475_v26 = vmul.f32 %v2957_v28, %v2957_v28 }
 0x1c6   : > { %v1367_v51 = vadd.f32 %v1366_v10, %v1365_v57  ;;  %v1564_v19 = vadd.f32 %v1563_v63, %v1562_v60  ;;  %v1581_v63 = vsel %vm1282_vm1, %v1468_v50, 0.0  ;;  %v1470_v10 = vmul.f32 %v2911_v24, %v2911_v24 }
 0x1c7   : > { %v1390_v24 = vsel %vm1282_vm1, %v2935_v47, 0.0  ;;  %v1394_v47 = vsel %vm1282_vm1, %v2951_v18, 0.0  ;;  %v1480_v50 = vmul.f32 %v3090_v4, %v3090_v4 }
 0x1c8   : > { %v1369_v12 = vadd.f32 %v1368_v20, %v1367_v51  ;;  %v1566_v52 = vadd.f32 %v1565_v17, %v1564_v19  ;;  %v1583_v51 = vsel %vm1282_vm1, %v1469_v5, 0.0  ;;  %v1471_v19 = vmul.f32 %v2921_v35, %v2921_v35 }
 0x1c9   : > { %v1585_v20 = vsel %vm1282_vm1, %v1470_v10, 0.0  ;;  %v1392_v35 = vsel %vm1282_vm1, %v2941_v62, 0.0 }
 0x1ca   : > { %v1568_v22 = vadd.f32 %v1567_v25, %v1566_v52  ;;  %v1371_v29 = vadd.f32 %v1370_v15, %v1369_v12  ;;  %v1587_v52 = vsel %vm1282_vm1, %v1471_v19, 0.0  ;;  %v1473_v25 = vmul.f32 %v2941_v62, %v2941_v62 }
 0x1cb   : > { %v1396_v62 = vsel %vm1282_vm1, %v2957_v28, 0.0  ;;  %v1400_v28 = vsel %vm1282_vm1, %v3003_v53, 0.0 }
 0x1cc   : > { %v1373_v30 = vadd.f32 %v1372_v56, %v1371_v29  ;;  %v1570_v27 = vadd.f32 %v1569_v23, %v1568_v22  ;;  %v1474_v22 = vmul.f32 %v2951_v18, %v2951_v18  ;;  %v1591_v56 = vsel %vm1282_vm1, %v1473_v25, 0.0 }
 0x1cd   : > { %v1398_v18 = vsel %vm1282_vm1, %v2997_v43, 0.0 }
 0x1ce   : > { %v1375_v36 = vadd.f32 %v1374_v33, %v1373_v30  ;;  %v1572_v37 = vadd.f32 %v1571_v31, %v1570_v27  ;;  %v1593_v31 = vsel %vm1282_vm1, %v1474_v22, 0.0  ;;  %v1476_v33 = vmul.f32 %v2997_v43, %v2997_v43 }
 0x1cf   : > { %v1402_v43 = vsel %vm1282_vm1, %v3038_v59, 0.0 }
 0x1d0   : > { %v1377_v61 = vadd.f32 %v1376_v38, %v1375_v36  ;;  %v1574_v44 = vadd.f32 %v1573_v40, %v1572_v37  ;;  %v1595_v37 = vsel %vm1282_vm1, %v1475_v26, 0.0  ;;  %v1477_v40 = vmul.f32 %v3003_v53, %v3003_v53 }
 0x1d1   : > { %v1404_v53 = vsel %vm1282_vm1, %v3047_v7, 0.0 }
 0x1d2   : > { %v1379_v46 = vadd.f32 %v1378_v6, %v1377_v61  ;;  %v1576_v32 = vadd.f32 %v1575_v45, %v1574_v44  ;;  %v1597_v61 = vsel %vm1282_vm1, %v1476_v33, 0.0  ;;  %v1478_v44 = vmul.f32 %v3038_v59, %v3038_v59 }
 0x1d3   : > { %v1599_v55 = vsel %vm1282_vm1, %v1477_v40, 0.0  ;;  %v1406_v59 = vsel %vm1282_vm1, %v3090_v4, 0.0 }
 0x1d4   : > { %v1381_v8 = vadd.f32 %v1380_v14, %v1379_v46  ;;  %v1578_v42 = vadd.f32 %v1577_v49, %v1576_v32  ;;  %v1479_v46 = vmul.f32 %v3047_v7, %v3047_v7  ;;  %v1601_v14 = vsel %vm1282_vm1, %v1478_v44, 0.0 }
 0x1d5   : > { %v1605_v7 = vsel %vm1282_vm1, %v1480_v50, 0.0 }
 0x1d6   : > { %v1383_v57 = vadd.f32 %v1382_v39, %v1381_v8  ;;  %v1580_v60 = vadd.f32 %v1579_v41, %v1578_v42  ;;  %v1603_v41 = vsel %vm1282_vm1, %v1479_v46, 0.0  ;;  %v1481_v39 = vmul.f32 %v3099_v58, %v3099_v58 }
 0x1d8   : > { %v1385_v2 = vadd.f32 %v1384_v48, %v1383_v57  ;;  %v1582_v17 = vadd.f32 %v1581_v63, %v1580_v60  ;;  %v1408_v60 = vsel %vm1282_vm1, %v3099_v58, 0.0  ;;  %v1607_v10 = vsel %vm1282_vm1, %v1481_v39, 0.0 }
 0x1da   : > { %v1387_v16 = vadd.f32 %v1386_v3, %v1385_v2  ;;  %v1584_v9 = vadd.f32 %v1583_v51, %v1582_v17 }
 0x1dc   : > { %v1389_v54 = vadd.f32 %v1388_v13, %v1387_v16  ;;  %v1586_v12 = vadd.f32 %v1585_v20, %v1584_v9 }
 0x1de   : > { %v1391_v15 = vadd.f32 %v1390_v24, %v1389_v54  ;;  %v1588_v21 = vadd.f32 %v1587_v52, %v1586_v12 }
 0x1e0   : > { %v1393_v29 = vadd.f32 %v1392_v35, %v1391_v15  ;;  %v1590_v23 = vadd.f32 %v1589_v0, %v1588_v21 }
 0x1e2   : > { %v1395_v30 = vadd.f32 %v1394_v47, %v1393_v29  ;;  %v1592_v27 = vadd.f32 %v1591_v56, %v1590_v23 }
 0x1e4   : > { %v1594_v34 = vadd.f32 %v1593_v31, %v1592_v27  ;;  %v1397_v36 = vadd.f32 %v1396_v62, %v1395_v30 }
 0x1e6   : > { %v1596_v38 = vadd.f32 %v1595_v37, %v1594_v34  ;;  %v1399_v1 = vadd.f32 %v1398_v18, %v1397_v36 }
 0x1e8   : > { %v1598_v45 = vadd.f32 %v1597_v61, %v1596_v38  ;;  %v1401_v6 = vadd.f32 %v1400_v28, %v1399_v1 }
 0x1ea   : > { %v1600_v32 = vadd.f32 %v1599_v55, %v1598_v45  ;;  %v1403_v49 = vadd.f32 %v1402_v43, %v1401_v6 }
 0x1ec   : > { %v1602_v8 = vadd.f32 %v1601_v14, %v1600_v32  ;;  %v1405_v42 = vadd.f32 %v1404_v53, %v1403_v49 }
 0x1ee   : > { %v1604_v5 = vadd.f32 %v1603_v41, %v1602_v8  ;;  %v1407_v57 = vadd.f32 %v1406_v59, %v1405_v42 }
 0x1f0   : > { %v1606_v63 = vadd.f32 %v1605_v7, %v1604_v5  ;;  %v1409_v48 = vadd.f32 %v1408_v60, %v1407_v57 }
 0x1f2   : > { %v1410_v2 = vrot.slane %v1409_v48, 4  ;;  %v1608_v17 = vadd.f32 %v1607_v10, %v1606_v63 }
 0x1f4   : > { %v1411_v4 = vadd.f32 %v1410_v2, %v1409_v48  ;;  %v1609_v51 = vrot.slane %v1608_v17, 4 }
 0x1f6   : > { %v1412_v3 = vrot.slane %v1411_v4, 2  ;;  %v1610_v19 = vadd.f32 %v1609_v51, %v1608_v17 }
 0x1f8   : > { %v1413_v16 = vadd.f32 %v1412_v3, %v1411_v4  ;;  %v1611_v58 = vrot.slane %v1610_v19, 2 }
 0x1fa   : > { %v1414_v9 = vrot.slane %v1413_v16, 1  ;;  %v1612_v20 = vadd.f32 %v1611_v58, %v1610_v19 }
 0x1fc   : > { %v1415_v13 = vadd.f32 %v1414_v9, %v1413_v16  ;;  %v1613_v11 = vrot.slane %v1612_v20, 1 }
 0x1fe   : > { %1417 = vst.msk [vmem:[%s266_s30] sm:$0x1] %vm1416_vm2, %v1415_v13  ;;  %v1614_v54 = vadd.f32 %v1613_v11, %v1612_v20 }
 0x1ff   : > { %2329 = shalt.err (!%p2326_p5)
}
 0x200   : > { %2242 = dma.vmem_to_hbm [thread:$0]  (%p2479_p4), %s1645_s5, 16, %s1647_s6, %s1625_s18   ;;  %1615 = vst.msk [vmem:[%s272_s7] sm:$0x1] %vm1416_vm2, %v1614_v54 }
 0x201   : > { %s1629_s26 = scalar_lea.sflag [#allocation5], %s3207_s21  ;;  %s2344_s29 = sshra.s32 %s1661_s9, 4  ;;  %s2345_s29 = int_to_ptr.hbm [resolvable:$true] %s2344_s29 }
 0x202   : > { %s2346_s30 = scalar_lea.hbm %s2345_s29, 1  ;;  %s2350_s12 = scalar_lea.hbm %s3287_s4, 8 }
 0x203   : > { %p2347_p6 = scmp.ne.s32.totalorder %s2345_s29, %s2346_s30  ;;  %p2351_p10 = scmp.lt.s32.totalorder %s2345_s29, %s3287_s4 }
 0x204   : > { %p2352_p11 = scmp.lt.s32.totalorder %s2350_s12, %s2346_s30 }
 0x205   : > { %p2348_p7 = pnand %p2347_p6, %p2479_p4 }
 0x206   : > { %p2353_p12 = por %p2352_p11, %p2351_p10 }
 0x207   : > { %p2349_p9 = pneg %p2348_p7 }
 0x209   : > { %p2354_p13 = pnand %p2353_p12, %p2349_p9 }
 0x20b   : > { %2357 = shalt.err (!%p2354_p13)
}
 0x20c   : > { %2243 = dma.vmem_to_hbm [thread:$0]  (%p2479_p4), %s1659_s8, 16, %s1661_s9, %s1629_s26  }
 0x20d PF: > { %p2253_p0 = scmp.ge.s32.totalorder %s2412_s20, 2  ;;  %s1683_s21 = sand.u32 1, %s2392_s15  }
 0x20e   : > { %s1684_s5 = scalar_lea.sflag [#allocation3], %s1683_s21 }
 0x20f   : > { %p2247_p1 = pnand %p2253_p0, %p2486_p8 }
 0x211   : > { %p2248_p2 = pneg %p2247_p1 }
 0x213   : > { %2383 = dma.done.wait (%p2248_p2), %s1684_s5, 16  }
 0x214   : > { %2385 = vsyncadd (%p2248_p2), %s1684_s5, 4294967280  ;;  %s1693_s6 = scalar_lea.sflag [#allocation5], %s1683_s21 }
 0x215   : > { %2387 = dma.done.wait (%p2248_p2), %s1693_s6, 16  }
 0x216   : > { %2389 = vsyncadd (%p2248_p2), %s1693_s6, 4294967280  ;;  %s21_s20 = sadd.s32 1, %s2412_s20   ;;  %s3290_s15 = smov %s2396_s16 }
 0x217   : > { %p18_p3 = scmp.ge.s32.totalorder %s21_s20, 10   ;;  %s3291_s16 = smov %s2400_s17 }
 0x218   : > { %s3292_s17 = smov %s2492_s28  ;;  %s3293_s18 = smov %s2408_s19 }
 0x219   : > { %s3294_s19 = smov %s3296_s23  ;;  %20 = sbr.rel (!%p18_p3) target bundleno = 6 (0x6), region = 95 }
 0x21e   :  { %1698 = vsyncpa [#allocation3], 1 }
 0x21f   :  { %1700 = vsyncpa [#allocation3 + $0x1], 1 }
 0x220   :  { %1701 = vsyncpa [#allocation5], 1 }
 0x221   :  { %1703 = vsyncpa [#allocation5 + $0x1], 1 }

</bundles_post_ra>
